<compile_context>
chip_gen: v7x
topology: tpu7x:2x2x1
jax: 0.10.0
libtpu: 0.0.40
codegen_flags: <defaults>
</compile_context>

<pallas_src>
import functools

import jax
import jax.numpy as jnp
import numpy as np
from jax.experimental import pallas as pl
from jax.experimental.pallas import tpu as pltpu


# ----------------------------- fused forward kernel -----------------------------
def _make_fused_lstm_kernel(S, Bp, H, L):
    """Build the fused kernel for static (seq, padded batch, hidden, layers)."""

    def kernel(*refs):
        # inputs: x2d, [w_ih_l, w_hh_l, b_l]*L, w_lin, b_lin ; then out ; then scratch
        x_ref = refs[0]
        wih_refs = [refs[1 + 3 * l + 0] for l in range(L)]
        whh_refs = [refs[1 + 3 * l + 1] for l in range(L)]
        b_refs = [refs[1 + 3 * l + 2] for l in range(L)]
        wlin_ref = refs[1 + 3 * L]
        blin_ref = refs[2 + 3 * L]
        out_ref = refs[3 + 3 * L]
        gx_ref, hbuf_ref, h_sc, c_sc = refs[4 + 3 * L:]

        for l in range(L):
            # -------- hoisted input projection: one matmul for the whole sequence.
            inp = x_ref[...] if l == 0 else hbuf_ref[...]        # (S*Bp, in_dim)
            gx_ref[...] = (
                jnp.dot(inp, wih_refs[l][...], preferred_element_type=jnp.float32)
                + b_refs[l][...]
            )                                                     # (S*Bp, 4H)

            h_sc[...] = jnp.zeros((Bp, H), jnp.float32)
            c_sc[...] = jnp.zeros((Bp, H), jnp.float32)

            whh_ref = whh_refs[l]
            write_hbuf = l < L - 1  # last layer: keep only h_sc, skip per-step stores

            # -------- serial recurrence, fully unrolled (S is small & static).
            # For long sequences switch to lax.fori_loop(0, S, ..., unroll=k).
            for t in range(S):
                row = t * Bp  # static, sublane-aligned (Bp % 8 == 0)
                gates = gx_ref[pl.ds(row, Bp), :] + jnp.dot(
                    h_sc[...], whh_ref[...], preferred_element_type=jnp.float32
                )                                                 # (Bp, 4H)

                # Full-width transcendentals on the EUP, then static lane slices.
                sg = jax.nn.sigmoid(gates)
                tg = jnp.tanh(gates)
                i_g = sg[:, 0 * H:1 * H]
                f_g = sg[:, 1 * H:2 * H]
                o_g = sg[:, 3 * H:4 * H]
                g_g = tg[:, 2 * H:3 * H]

                c_new = f_g * c_sc[...] + i_g * g_g
                h_new = o_g * jnp.tanh(c_new)
                c_sc[...] = c_new
                h_sc[...] = h_new
                if write_hbuf:
                    hbuf_ref[pl.ds(row, Bp), :] = h_new

        # -------- final Linear on ht[-1] of the last layer, fused in.
        out_ref[...] = (
            jnp.dot(h_sc[...], wlin_ref[...], preferred_element_type=jnp.float32)
            + blin_ref[...]
        ).astype(out_ref.dtype)

    return kernel


# ------------------------------- Python wrapper ----------------------------------
def _pallas_lstm_forward(x, params):
    """x: (batch, seq, embedding_dim) [batch_first]; returns (batch, 2)."""
    B, S, E = x.shape
    L = len(params["lstm"])
    H = params["lstm"][0]["w_hh"].shape[0]
    O = params["linear"]["w"].shape[1]
    Bp = ((B + 7) // 8) * 8  # pad batch to f32 sublane multiple

    x_tm = jnp.transpose(x, (1, 0, 2))                       # (S, B, E) time-major
    if Bp != B:
        x_tm = jnp.pad(x_tm, ((0, 0), (0, Bp - B), (0, 0)))
    x2d = x_tm.reshape(S * Bp, E)                            # row = t*Bp + b

    inputs = [x2d]
    in_specs = [pl.BlockSpec((S * Bp, E), lambda: (0, 0))]
    for layer in params["lstm"]:
        inputs += [layer["w_ih"], layer["w_hh"], layer["b"]]
        in_specs += [
            pl.BlockSpec(layer["w_ih"].shape, lambda: (0, 0)),
            pl.BlockSpec(layer["w_hh"].shape, lambda: (0, 0)),
            pl.BlockSpec(layer["b"].shape, lambda: (0, 0)),
        ]
    inputs += [params["linear"]["w"], params["linear"]["b"]]
    in_specs += [
        pl.BlockSpec((H, O), lambda: (0, 0)),
        pl.BlockSpec((1, O), lambda: (0, 0)),
    ]

    # Advisory cost estimate so XLA schedules the surrounding transpose/slice well.
    flops = 2 * Bp * H * O
    in_dim = E
    for _ in range(L):
        flops += 2 * S * Bp * in_dim * 4 * H      # hoisted input projection
        flops += 2 * S * Bp * H * 4 * H           # recurrent matmuls
        in_dim = H
    transcendentals = L * S * Bp * (4 * H + 4 * H + H)
    n_elems = sum(int(np.prod(a.shape)) for a in inputs) + Bp * O
    cost = pl.CostEstimate(flops=int(flops),
                           transcendentals=int(transcendentals),
                           bytes_accessed=int(4 * n_elems))

    kernel = _make_fused_lstm_kernel(S=S, Bp=Bp, H=H, L=L)

    out = pl.pallas_call(
        kernel,
        out_shape=jax.ShapeDtypeStruct((Bp, O), jnp.float32),
        in_specs=in_specs,
        out_specs=pl.BlockSpec((Bp, O), lambda: (0, 0)),
        scratch_shapes=[
            pltpu.VMEM((S * Bp, 4 * H), jnp.float32),  # precomputed input gates
            pltpu.VMEM((S * Bp, H), jnp.float32),      # previous layer's hidden states
            pltpu.VMEM((Bp, H), jnp.float32),          # h
            pltpu.VMEM((Bp, H), jnp.float32),          # c
        ],
        cost_estimate=cost,
    )(*inputs)

    return out[:B]


lstm_module_forward = jax.jit(_pallas_lstm_forward)


# ------------------------------ pure-JAX reference -------------------------------
def lstm_module_reference(x, params):
    x_tm = jnp.transpose(x, (1, 0, 2))
    h_all = x_tm
    for layer in params["lstm"]:
        H = layer["w_hh"].shape[0]
        B = x.shape[0]
        h = jnp.zeros((B, H), jnp.float32)
        c = jnp.zeros((B, H), jnp.float32)
        outs = []
        for t in range(h_all.shape[0]):
            gates = h_all[t] @ layer["w_ih"] + h @ layer["w_hh"] + layer["b"][0]
            i = jax.nn.sigmoid(gates[:, 0 * H:1 * H])
            f = jax.nn.sigmoid(gates[:, 1 * H:2 * H])
            g = jnp.tanh(gates[:, 2 * H:3 * H])
            o = jax.nn.sigmoid(gates[:, 3 * H:4 * H])
            c = f * c + i * g
            h = o * jnp.tanh(c)
            outs.append(h)
        h_all = jnp.stack(outs, axis=0)
    return h_all[-1] @ params["linear"]["w"] + params["linear"]["b"][0]


# --------------------------------- param init ------------------------------------
def init_params(key, embedding_dim, hidden_dim, num_layers):
    """Deterministic init mimicking PyTorch's uniform(-1/sqrt(H), 1/sqrt(H))."""
    bound = 1.0 / np.sqrt(hidden_dim)
    lstm_params = []
    in_dim = embedding_dim
    for _ in range(num_layers):
        key, k1, k2, k3, k4 = jax.random.split(key, 5)
        w_ih = jax.random.uniform(k1, (in_dim, 4 * hidden_dim),
                                  jnp.float32, -bound, bound)
        w_hh = jax.random.uniform(k2, (hidden_dim, 4 * hidden_dim),
                                  jnp.float32, -bound, bound)
        b_ih = jax.random.uniform(k3, (4 * hidden_dim,),
                                  jnp.float32, -bound, bound)
        b_hh = jax.random.uniform(k4, (4 * hidden_dim,),
                                  jnp.float32, -bound, bound)
        lstm_params.append({
            "w_ih": w_ih,
            "w_hh": w_hh,
            "b": (b_ih + b_hh)[None, :],  # (1, 4H)
        })
        in_dim = hidden_dim

    key, k5, k6 = jax.random.split(key, 3)
    lin_bound = 1.0 / np.sqrt(hidden_dim)
    w_lin = jax.random.uniform(k5, (hidden_dim, 2), jnp.float32,
                               -lin_bound, lin_bound)
    b_lin = jax.random.uniform(k6, (2,), jnp.float32,
                               -lin_bound, lin_bound)[None, :]  # (1, 2)

    return {"lstm": lstm_params, "linear": {"w": w_lin, "b": b_lin}}


if __name__ == "__main__":
    embedding_dim = 16
    hidden_dim = 32
    num_layers = 2
    batch = 2
    seq = 8

    key = jax.random.PRNGKey(0)
    kx, kp = jax.random.split(key)
    x = jax.random.normal(kx, (batch, seq, embedding_dim), jnp.float32)
    params = init_params(kp, embedding_dim, hidden_dim, num_layers)

    out = lstm_module_forward(x, params)
    out = jax.block_until_ready(out)

    ref = lstm_module_reference(x, params)
    np.testing.assert_allclose(np.asarray(out), np.asarray(ref),
                               rtol=1e-4, atol=1e-4)
    assert out.shape == (batch, 2)

    print("KERNEL_OK")
</pallas_src>

<mosaic_0001>
module attributes {stable_mosaic.version = 11 : i64} {
  func.func @kernel(%arg0: memref<64x16xf32, #tpu.memory_space<vmem>>, %arg1: memref<16x128xf32, #tpu.memory_space<vmem>>, %arg2: memref<32x128xf32, #tpu.memory_space<vmem>>, %arg3: memref<1x128xf32, #tpu.memory_space<vmem>>, %arg4: memref<32x128xf32, #tpu.memory_space<vmem>>, %arg5: memref<32x128xf32, #tpu.memory_space<vmem>>, %arg6: memref<1x128xf32, #tpu.memory_space<vmem>>, %arg7: memref<32x2xf32, #tpu.memory_space<vmem>>, %arg8: memref<1x2xf32, #tpu.memory_space<vmem>>, %arg9: memref<8x2xf32, #tpu.memory_space<vmem>>, %arg10: memref<64x128xf32, #tpu.memory_space<vmem>>, %arg11: memref<64x32xf32, #tpu.memory_space<vmem>>, %arg12: memref<8x32xf32, #tpu.memory_space<vmem>>, %arg13: memref<8x32xf32, #tpu.memory_space<vmem>>) attributes {dimension_semantics = [], scalar_prefetch = 0 : i64, scratch_operands = 4 : i64, tpu.core_type = #tpu.core_type<tc>} {
    %c0 = arith.constant 0 : index
    %c0_0 = arith.constant 0 : index
    %0 = vector.load %arg0[%c0, %c0_0] : memref<64x16xf32, #tpu.memory_space<vmem>>, vector<64x16xf32>
    %c0_1 = arith.constant 0 : index
    %c0_2 = arith.constant 0 : index
    %1 = vector.load %arg1[%c0_1, %c0_2] : memref<16x128xf32, #tpu.memory_space<vmem>>, vector<16x128xf32>
    %cst = arith.constant dense<0.000000e+00> : vector<64x128xf32>
    %2 = tpu.matmul %0, %1, %cst {dimension_numbers = #tpu.dot_dimension_numbers<[1], [0], [0], [1], [0, 0, 1, 1], [], []>} : vector<64x16xf32>, vector<16x128xf32>, vector<64x128xf32> -> vector<64x128xf32>
    %c0_3 = arith.constant 0 : index
    %c0_4 = arith.constant 0 : index
    %3 = vector.load %arg3[%c0_3, %c0_4] : memref<1x128xf32, #tpu.memory_space<vmem>>, vector<1x128xf32>
    %4 = vector.broadcast %3 : vector<1x128xf32> to vector<64x128xf32>
    %5 = arith.addf %2, %4 : vector<64x128xf32>
    %c0_5 = arith.constant 0 : index
    %c0_6 = arith.constant 0 : index
    %6 = vector.load %arg10[%c0_5, %c0_6] : memref<64x128xf32, #tpu.memory_space<vmem>>, vector<64x128xf32>
    tpu.vector_store %arg10[%c0_5, %c0_6], %5 {strides = array<i32>} : memref<64x128xf32, #tpu.memory_space<vmem>>, vector<64x128xf32>,
    %cst_7 = arith.constant 0.000000e+00 : f32
    %7 = vector.broadcast %cst_7 : f32 to vector<8x32xf32>
    %c0_8 = arith.constant 0 : index
    %c0_9 = arith.constant 0 : index
    %8 = vector.load %arg12[%c0_8, %c0_9] : memref<8x32xf32, #tpu.memory_space<vmem>>, vector<8x32xf32>
    tpu.vector_store %arg12[%c0_8, %c0_9], %7 {strides = array<i32>} : memref<8x32xf32, #tpu.memory_space<vmem>>, vector<8x32xf32>,
    %cst_10 = arith.constant 0.000000e+00 : f32
    %9 = vector.broadcast %cst_10 : f32 to vector<8x32xf32>
    %c0_11 = arith.constant 0 : index
    %c0_12 = arith.constant 0 : index
    %10 = vector.load %arg13[%c0_11, %c0_12] : memref<8x32xf32, #tpu.memory_space<vmem>>, vector<8x32xf32>
    tpu.vector_store %arg13[%c0_11, %c0_12], %9 {strides = array<i32>} : memref<8x32xf32, #tpu.memory_space<vmem>>, vector<8x32xf32>,
    %c0_13 = arith.constant 0 : index
    %c0_14 = arith.constant 0 : index
    %11 = vector.load %arg10[%c0_13, %c0_14] : memref<64x128xf32, #tpu.memory_space<vmem>>, vector<8x128xf32>
    %c0_15 = arith.constant 0 : index
    %c0_16 = arith.constant 0 : index
    %12 = vector.load %arg12[%c0_15, %c0_16] : memref<8x32xf32, #tpu.memory_space<vmem>>, vector<8x32xf32>
    %c0_17 = arith.constant 0 : index
    %c0_18 = arith.constant 0 : index
    %13 = vector.load %arg2[%c0_17, %c0_18] : memref<32x128xf32, #tpu.memory_space<vmem>>, vector<32x128xf32>
    %cst_19 = arith.constant dense<0.000000e+00> : vector<8x128xf32>
    %14 = tpu.matmul %12, %13, %cst_19 {dimension_numbers = #tpu.dot_dimension_numbers<[1], [0], [0], [1], [0, 0, 1, 1], [], []>} : vector<8x32xf32>, vector<32x128xf32>, vector<8x128xf32> -> vector<8x128xf32>
    %15 = arith.addf %11, %14 : vector<8x128xf32>
    %16 = arith.negf %15 : vector<8x128xf32>
    %17 = math.exp %16 : vector<8x128xf32>
    %cst_20 = arith.constant 1.000000e+00 : f32
    %18 = vector.broadcast %cst_20 : f32 to vector<8x128xf32>
    %19 = arith.addf %18, %17 : vector<8x128xf32>
    %20 = arith.divf %18, %19 : vector<8x128xf32>
    %21 = math.tanh %15 : vector<8x128xf32>
    %22 = vector.extract_strided_slice %20 {offsets = [0, 0], sizes = [8, 32], strides = [1, 1]} : vector<8x128xf32> to vector<8x32xf32>
    %23 = vector.extract_strided_slice %20 {offsets = [0, 32], sizes = [8, 32], strides = [1, 1]} : vector<8x128xf32> to vector<8x32xf32>
    %24 = vector.extract_strided_slice %20 {offsets = [0, 96], sizes = [8, 32], strides = [1, 1]} : vector<8x128xf32> to vector<8x32xf32>
    %25 = vector.extract_strided_slice %21 {offsets = [0, 64], sizes = [8, 32], strides = [1, 1]} : vector<8x128xf32> to vector<8x32xf32>
    %c0_21 = arith.constant 0 : index
    %c0_22 = arith.constant 0 : index
    %26 = vector.load %arg13[%c0_21, %c0_22] : memref<8x32xf32, #tpu.memory_space<vmem>>, vector<8x32xf32>
    %27 = arith.mulf %23, %26 : vector<8x32xf32>
    %28 = arith.mulf %22, %25 : vector<8x32xf32>
    %29 = arith.addf %27, %28 : vector<8x32xf32>
    %30 = math.tanh %29 : vector<8x32xf32>
    %31 = arith.mulf %24, %30 : vector<8x32xf32>
    %c0_23 = arith.constant 0 : index
    %c0_24 = arith.constant 0 : index
    %32 = vector.load %arg13[%c0_23, %c0_24] : memref<8x32xf32, #tpu.memory_space<vmem>>, vector<8x32xf32>
    tpu.vector_store %arg13[%c0_23, %c0_24], %29 {strides = array<i32>} : memref<8x32xf32, #tpu.memory_space<vmem>>, vector<8x32xf32>,
    %c0_25 = arith.constant 0 : index
    %c0_26 = arith.constant 0 : index
    %33 = vector.load %arg12[%c0_25, %c0_26] : memref<8x32xf32, #tpu.memory_space<vmem>>, vector<8x32xf32>
    tpu.vector_store %arg12[%c0_25, %c0_26], %31 {strides = array<i32>} : memref<8x32xf32, #tpu.memory_space<vmem>>, vector<8x32xf32>,
    %c0_27 = arith.constant 0 : index
    %c0_28 = arith.constant 0 : index
    %34 = vector.load %arg11[%c0_27, %c0_28] : memref<64x32xf32, #tpu.memory_space<vmem>>, vector<8x32xf32>
    tpu.vector_store %arg11[%c0_27, %c0_28], %31 {strides = array<i32>} : memref<64x32xf32, #tpu.memory_space<vmem>>, vector<8x32xf32>,
    %c8 = arith.constant 8 : index
    %c0_29 = arith.constant 0 : index
    %35 = vector.load %arg10[%c8, %c0_29] : memref<64x128xf32, #tpu.memory_space<vmem>>, vector<8x128xf32>
    %c0_30 = arith.constant 0 : index
    %c0_31 = arith.constant 0 : index
    %36 = vector.load %arg12[%c0_30, %c0_31] : memref<8x32xf32, #tpu.memory_space<vmem>>, vector<8x32xf32>
    %c0_32 = arith.constant 0 : index
    %c0_33 = arith.constant 0 : index
    %37 = vector.load %arg2[%c0_32, %c0_33] : memref<32x128xf32, #tpu.memory_space<vmem>>, vector<32x128xf32>
    %cst_34 = arith.constant dense<0.000000e+00> : vector<8x128xf32>
    %38 = tpu.matmul %36, %37, %cst_34 {dimension_numbers = #tpu.dot_dimension_numbers<[1], [0], [0], [1], [0, 0, 1, 1], [], []>} : vector<8x32xf32>, vector<32x128xf32>, vector<8x128xf32> -> vector<8x128xf32>
    %39 = arith.addf %35, %38 : vector<8x128xf32>
    %40 = arith.negf %39 : vector<8x128xf32>
    %41 = math.exp %40 : vector<8x128xf32>
    %cst_35 = arith.constant 1.000000e+00 : f32
    %42 = vector.broadcast %cst_35 : f32 to vector<8x128xf32>
    %43 = arith.addf %42, %41 : vector<8x128xf32>
    %44 = arith.divf %42, %43 : vector<8x128xf32>
    %45 = math.tanh %39 : vector<8x128xf32>
    %46 = vector.extract_strided_slice %44 {offsets = [0, 0], sizes = [8, 32], strides = [1, 1]} : vector<8x128xf32> to vector<8x32xf32>
    %47 = vector.extract_strided_slice %44 {offsets = [0, 32], sizes = [8, 32], strides = [1, 1]} : vector<8x128xf32> to vector<8x32xf32>
    %48 = vector.extract_strided_slice %44 {offsets = [0, 96], sizes = [8, 32], strides = [1, 1]} : vector<8x128xf32> to vector<8x32xf32>
    %49 = vector.extract_strided_slice %45 {offsets = [0, 64], sizes = [8, 32], strides = [1, 1]} : vector<8x128xf32> to vector<8x32xf32>
    %c0_36 = arith.constant 0 : index
    %c0_37 = arith.constant 0 : index
    %50 = vector.load %arg13[%c0_36, %c0_37] : memref<8x32xf32, #tpu.memory_space<vmem>>, vector<8x32xf32>
    %51 = arith.mulf %47, %50 : vector<8x32xf32>
    %52 = arith.mulf %46, %49 : vector<8x32xf32>
    %53 = arith.addf %51, %52 : vector<8x32xf32>
    %54 = math.tanh %53 : vector<8x32xf32>
    %55 = arith.mulf %48, %54 : vector<8x32xf32>
    %c0_38 = arith.constant 0 : index
    %c0_39 = arith.constant 0 : index
    %56 = vector.load %arg13[%c0_38, %c0_39] : memref<8x32xf32, #tpu.memory_space<vmem>>, vector<8x32xf32>
    tpu.vector_store %arg13[%c0_38, %c0_39], %53 {strides = array<i32>} : memref<8x32xf32, #tpu.memory_space<vmem>>, vector<8x32xf32>,
    %c0_40 = arith.constant 0 : index
    %c0_41 = arith.constant 0 : index
    %57 = vector.load %arg12[%c0_40, %c0_41] : memref<8x32xf32, #tpu.memory_space<vmem>>, vector<8x32xf32>
    tpu.vector_store %arg12[%c0_40, %c0_41], %55 {strides = array<i32>} : memref<8x32xf32, #tpu.memory_space<vmem>>, vector<8x32xf32>,
    %c8_42 = arith.constant 8 : index
    %c0_43 = arith.constant 0 : index
    %58 = vector.load %arg11[%c8_42, %c0_43] : memref<64x32xf32, #tpu.memory_space<vmem>>, vector<8x32xf32>
    tpu.vector_store %arg11[%c8_42, %c0_43], %55 {strides = array<i32>} : memref<64x32xf32, #tpu.memory_space<vmem>>, vector<8x32xf32>,
    %c16 = arith.constant 16 : index
    %c0_44 = arith.constant 0 : index
    %59 = vector.load %arg10[%c16, %c0_44] : memref<64x128xf32, #tpu.memory_space<vmem>>, vector<8x128xf32>
    %c0_45 = arith.constant 0 : index
    %c0_46 = arith.constant 0 : index
    %60 = vector.load %arg12[%c0_45, %c0_46] : memref<8x32xf32, #tpu.memory_space<vmem>>, vector<8x32xf32>
    %c0_47 = arith.constant 0 : index
    %c0_48 = arith.constant 0 : index
    %61 = vector.load %arg2[%c0_47, %c0_48] : memref<32x128xf32, #tpu.memory_space<vmem>>, vector<32x128xf32>
    %cst_49 = arith.constant dense<0.000000e+00> : vector<8x128xf32>
    %62 = tpu.matmul %60, %61, %cst_49 {dimension_numbers = #tpu.dot_dimension_numbers<[1], [0], [0], [1], [0, 0, 1, 1], [], []>} : vector<8x32xf32>, vector<32x128xf32>, vector<8x128xf32> -> vector<8x128xf32>
    %63 = arith.addf %59, %62 : vector<8x128xf32>
    %64 = arith.negf %63 : vector<8x128xf32>
    %65 = math.exp %64 : vector<8x128xf32>
    %cst_50 = arith.constant 1.000000e+00 : f32
    %66 = vector.broadcast %cst_50 : f32 to vector<8x128xf32>
    %67 = arith.addf %66, %65 : vector<8x128xf32>
    %68 = arith.divf %66, %67 : vector<8x128xf32>
    %69 = math.tanh %63 : vector<8x128xf32>
    %70 = vector.extract_strided_slice %68 {offsets = [0, 0], sizes = [8, 32], strides = [1, 1]} : vector<8x128xf32> to vector<8x32xf32>
    %71 = vector.extract_strided_slice %68 {offsets = [0, 32], sizes = [8, 32], strides = [1, 1]} : vector<8x128xf32> to vector<8x32xf32>
    %72 = vector.extract_strided_slice %68 {offsets = [0, 96], sizes = [8, 32], strides = [1, 1]} : vector<8x128xf32> to vector<8x32xf32>
    %73 = vector.extract_strided_slice %69 {offsets = [0, 64], sizes = [8, 32], strides = [1, 1]} : vector<8x128xf32> to vector<8x32xf32>
    %c0_51 = arith.constant 0 : index
    %c0_52 = arith.constant 0 : index
    %74 = vector.load %arg13[%c0_51, %c0_52] : memref<8x32xf32, #tpu.memory_space<vmem>>, vector<8x32xf32>
    %75 = arith.mulf %71, %74 : vector<8x32xf32>
    %76 = arith.mulf %70, %73 : vector<8x32xf32>
    %77 = arith.addf %75, %76 : vector<8x32xf32>
    %78 = math.tanh %77 : vector<8x32xf32>
    %79 = arith.mulf %72, %78 : vector<8x32xf32>
    %c0_53 = arith.constant 0 : index
    %c0_54 = arith.constant 0 : index
    %80 = vector.load %arg13[%c0_53, %c0_54] : memref<8x32xf32, #tpu.memory_space<vmem>>, vector<8x32xf32>
    tpu.vector_store %arg13[%c0_53, %c0_54], %77 {strides = array<i32>} : memref<8x32xf32, #tpu.memory_space<vmem>>, vector<8x32xf32>,
    %c0_55 = arith.constant 0 : index
    %c0_56 = arith.constant 0 : index
    %81 = vector.load %arg12[%c0_55, %c0_56] : memref<8x32xf32, #tpu.memory_space<vmem>>, vector<8x32xf32>
    tpu.vector_store %arg12[%c0_55, %c0_56], %79 {strides = array<i32>} : memref<8x32xf32, #tpu.memory_space<vmem>>, vector<8x32xf32>,
    %c16_57 = arith.constant 16 : index
    %c0_58 = arith.constant 0 : index
    %82 = vector.load %arg11[%c16_57, %c0_58] : memref<64x32xf32, #tpu.memory_space<vmem>>, vector<8x32xf32>
    tpu.vector_store %arg11[%c16_57, %c0_58], %79 {strides = array<i32>} : memref<64x32xf32, #tpu.memory_space<vmem>>, vector<8x32xf32>,
    %c24 = arith.constant 24 : index
    %c0_59 = arith.constant 0 : index
    %83 = vector.load %arg10[%c24, %c0_59] : memref<64x128xf32, #tpu.memory_space<vmem>>, vector<8x128xf32>
    %c0_60 = arith.constant 0 : index
    %c0_61 = arith.constant 0 : index
    %84 = vector.load %arg12[%c0_60, %c0_61] : memref<8x32xf32, #tpu.memory_space<vmem>>, vector<8x32xf32>
    %c0_62 = arith.constant 0 : index
    %c0_63 = arith.constant 0 : index
    %85 = vector.load %arg2[%c0_62, %c0_63] : memref<32x128xf32, #tpu.memory_space<vmem>>, vector<32x128xf32>
    %cst_64 = arith.constant dense<0.000000e+00> : vector<8x128xf32>
    %86 = tpu.matmul %84, %85, %cst_64 {dimension_numbers = #tpu.dot_dimension_numbers<[1], [0], [0], [1], [0, 0, 1, 1], [], []>} : vector<8x32xf32>, vector<32x128xf32>, vector<8x128xf32> -> vector<8x128xf32>
    %87 = arith.addf %83, %86 : vector<8x128xf32>
    %88 = arith.negf %87 : vector<8x128xf32>
    %89 = math.exp %88 : vector<8x128xf32>
    %cst_65 = arith.constant 1.000000e+00 : f32
    %90 = vector.broadcast %cst_65 : f32 to vector<8x128xf32>
    %91 = arith.addf %90, %89 : vector<8x128xf32>
    %92 = arith.divf %90, %91 : vector<8x128xf32>
    %93 = math.tanh %87 : vector<8x128xf32>
    %94 = vector.extract_strided_slice %92 {offsets = [0, 0], sizes = [8, 32], strides = [1, 1]} : vector<8x128xf32> to vector<8x32xf32>
    %95 = vector.extract_strided_slice %92 {offsets = [0, 32], sizes = [8, 32], strides = [1, 1]} : vector<8x128xf32> to vector<8x32xf32>
    %96 = vector.extract_strided_slice %92 {offsets = [0, 96], sizes = [8, 32], strides = [1, 1]} : vector<8x128xf32> to vector<8x32xf32>
    %97 = vector.extract_strided_slice %93 {offsets = [0, 64], sizes = [8, 32], strides = [1, 1]} : vector<8x128xf32> to vector<8x32xf32>
    %c0_66 = arith.constant 0 : index
    %c0_67 = arith.constant 0 : index
    %98 = vector.load %arg13[%c0_66, %c0_67] : memref<8x32xf32, #tpu.memory_space<vmem>>, vector<8x32xf32>
    %99 = arith.mulf %95, %98 : vector<8x32xf32>
    %100 = arith.mulf %94, %97 : vector<8x32xf32>
    %101 = arith.addf %99, %100 : vector<8x32xf32>
    %102 = math.tanh %101 : vector<8x32xf32>
    %103 = arith.mulf %96, %102 : vector<8x32xf32>
    %c0_68 = arith.constant 0 : index
    %c0_69 = arith.constant 0 : index
    %104 = vector.load %arg13[%c0_68, %c0_69] : memref<8x32xf32, #tpu.memory_space<vmem>>, vector<8x32xf32>
    tpu.vector_store %arg13[%c0_68, %c0_69], %101 {strides = array<i32>} : memref<8x32xf32, #tpu.memory_space<vmem>>, vector<8x32xf32>,
    %c0_70 = arith.constant 0 : index
    %c0_71 = arith.constant 0 : index
    %105 = vector.load %arg12[%c0_70, %c0_71] : memref<8x32xf32, #tpu.memory_space<vmem>>, vector<8x32xf32>
    tpu.vector_store %arg12[%c0_70, %c0_71], %103 {strides = array<i32>} : memref<8x32xf32, #tpu.memory_space<vmem>>, vector<8x32xf32>,
    %c24_72 = arith.constant 24 : index
    %c0_73 = arith.constant 0 : index
    %106 = vector.load %arg11[%c24_72, %c0_73] : memref<64x32xf32, #tpu.memory_space<vmem>>, vector<8x32xf32>
    tpu.vector_store %arg11[%c24_72, %c0_73], %103 {strides = array<i32>} : memref<64x32xf32, #tpu.memory_space<vmem>>, vector<8x32xf32>,
    %c32 = arith.constant 32 : index
    %c0_74 = arith.constant 0 : index
    %107 = vector.load %arg10[%c32, %c0_74] : memref<64x128xf32, #tpu.memory_space<vmem>>, vector<8x128xf32>
    %c0_75 = arith.constant 0 : index
    %c0_76 = arith.constant 0 : index
    %108 = vector.load %arg12[%c0_75, %c0_76] : memref<8x32xf32, #tpu.memory_space<vmem>>, vector<8x32xf32>
    %c0_77 = arith.constant 0 : index
    %c0_78 = arith.constant 0 : index
    %109 = vector.load %arg2[%c0_77, %c0_78] : memref<32x128xf32, #tpu.memory_space<vmem>>, vector<32x128xf32>
    %cst_79 = arith.constant dense<0.000000e+00> : vector<8x128xf32>
    %110 = tpu.matmul %108, %109, %cst_79 {dimension_numbers = #tpu.dot_dimension_numbers<[1], [0], [0], [1], [0, 0, 1, 1], [], []>} : vector<8x32xf32>, vector<32x128xf32>, vector<8x128xf32> -> vector<8x128xf32>
    %111 = arith.addf %107, %110 : vector<8x128xf32>
    %112 = arith.negf %111 : vector<8x128xf32>
    %113 = math.exp %112 : vector<8x128xf32>
    %cst_80 = arith.constant 1.000000e+00 : f32
    %114 = vector.broadcast %cst_80 : f32 to vector<8x128xf32>
    %115 = arith.addf %114, %113 : vector<8x128xf32>
    %116 = arith.divf %114, %115 : vector<8x128xf32>
    %117 = math.tanh %111 : vector<8x128xf32>
    %118 = vector.extract_strided_slice %116 {offsets = [0, 0], sizes = [8, 32], strides = [1, 1]} : vector<8x128xf32> to vector<8x32xf32>
    %119 = vector.extract_strided_slice %116 {offsets = [0, 32], sizes = [8, 32], strides = [1, 1]} : vector<8x128xf32> to vector<8x32xf32>
    %120 = vector.extract_strided_slice %116 {offsets = [0, 96], sizes = [8, 32], strides = [1, 1]} : vector<8x128xf32> to vector<8x32xf32>
    %121 = vector.extract_strided_slice %117 {offsets = [0, 64], sizes = [8, 32], strides = [1, 1]} : vector<8x128xf32> to vector<8x32xf32>
    %c0_81 = arith.constant 0 : index
    %c0_82 = arith.constant 0 : index
    %122 = vector.load %arg13[%c0_81, %c0_82] : memref<8x32xf32, #tpu.memory_space<vmem>>, vector<8x32xf32>
    %123 = arith.mulf %119, %122 : vector<8x32xf32>
    %124 = arith.mulf %118, %121 : vector<8x32xf32>
    %125 = arith.addf %123, %124 : vector<8x32xf32>
    %126 = math.tanh %125 : vector<8x32xf32>
    %127 = arith.mulf %120, %126 : vector<8x32xf32>
    %c0_83 = arith.constant 0 : index
    %c0_84 = arith.constant 0 : index
    %128 = vector.load %arg13[%c0_83, %c0_84] : memref<8x32xf32, #tpu.memory_space<vmem>>, vector<8x32xf32>
    tpu.vector_store %arg13[%c0_83, %c0_84], %125 {strides = array<i32>} : memref<8x32xf32, #tpu.memory_space<vmem>>, vector<8x32xf32>,
    %c0_85 = arith.constant 0 : index
    %c0_86 = arith.constant 0 : index
    %129 = vector.load %arg12[%c0_85, %c0_86] : memref<8x32xf32, #tpu.memory_space<vmem>>, vector<8x32xf32>
    tpu.vector_store %arg12[%c0_85, %c0_86], %127 {strides = array<i32>} : memref<8x32xf32, #tpu.memory_space<vmem>>, vector<8x32xf32>,
    %c32_87 = arith.constant 32 : index
    %c0_88 = arith.constant 0 : index
    %130 = vector.load %arg11[%c32_87, %c0_88] : memref<64x32xf32, #tpu.memory_space<vmem>>, vector<8x32xf32>
    tpu.vector_store %arg11[%c32_87, %c0_88], %127 {strides = array<i32>} : memref<64x32xf32, #tpu.memory_space<vmem>>, vector<8x32xf32>,
    %c40 = arith.constant 40 : index
    %c0_89 = arith.constant 0 : index
    %131 = vector.load %arg10[%c40, %c0_89] : memref<64x128xf32, #tpu.memory_space<vmem>>, vector<8x128xf32>
    %c0_90 = arith.constant 0 : index
    %c0_91 = arith.constant 0 : index
    %132 = vector.load %arg12[%c0_90, %c0_91] : memref<8x32xf32, #tpu.memory_space<vmem>>, vector<8x32xf32>
    %c0_92 = arith.constant 0 : index
    %c0_93 = arith.constant 0 : index
    %133 = vector.load %arg2[%c0_92, %c0_93] : memref<32x128xf32, #tpu.memory_space<vmem>>, vector<32x128xf32>
    %cst_94 = arith.constant dense<0.000000e+00> : vector<8x128xf32>
    %134 = tpu.matmul %132, %133, %cst_94 {dimension_numbers = #tpu.dot_dimension_numbers<[1], [0], [0], [1], [0, 0, 1, 1], [], []>} : vector<8x32xf32>, vector<32x128xf32>, vector<8x128xf32> -> vector<8x128xf32>
    %135 = arith.addf %131, %134 : vector<8x128xf32>
    %136 = arith.negf %135 : vector<8x128xf32>
    %137 = math.exp %136 : vector<8x128xf32>
    %cst_95 = arith.constant 1.000000e+00 : f32
    %138 = vector.broadcast %cst_95 : f32 to vector<8x128xf32>
    %139 = arith.addf %138, %137 : vector<8x128xf32>
    %140 = arith.divf %138, %139 : vector<8x128xf32>
    %141 = math.tanh %135 : vector<8x128xf32>
    %142 = vector.extract_strided_slice %140 {offsets = [0, 0], sizes = [8, 32], strides = [1, 1]} : vector<8x128xf32> to vector<8x32xf32>
    %143 = vector.extract_strided_slice %140 {offsets = [0, 32], sizes = [8, 32], strides = [1, 1]} : vector<8x128xf32> to vector<8x32xf32>
    %144 = vector.extract_strided_slice %140 {offsets = [0, 96], sizes = [8, 32], strides = [1, 1]} : vector<8x128xf32> to vector<8x32xf32>
    %145 = vector.extract_strided_slice %141 {offsets = [0, 64], sizes = [8, 32], strides = [1, 1]} : vector<8x128xf32> to vector<8x32xf32>
    %c0_96 = arith.constant 0 : index
    %c0_97 = arith.constant 0 : index
    %146 = vector.load %arg13[%c0_96, %c0_97] : memref<8x32xf32, #tpu.memory_space<vmem>>, vector<8x32xf32>
    %147 = arith.mulf %143, %146 : vector<8x32xf32>
    %148 = arith.mulf %142, %145 : vector<8x32xf32>
    %149 = arith.addf %147, %148 : vector<8x32xf32>
    %150 = math.tanh %149 : vector<8x32xf32>
    %151 = arith.mulf %144, %150 : vector<8x32xf32>
    %c0_98 = arith.constant 0 : index
    %c0_99 = arith.constant 0 : index
    %152 = vector.load %arg13[%c0_98, %c0_99] : memref<8x32xf32, #tpu.memory_space<vmem>>, vector<8x32xf32>
    tpu.vector_store %arg13[%c0_98, %c0_99], %149 {strides = array<i32>} : memref<8x32xf32, #tpu.memory_space<vmem>>, vector<8x32xf32>,
    %c0_100 = arith.constant 0 : index
    %c0_101 = arith.constant 0 : index
    %153 = vector.load %arg12[%c0_100, %c0_101] : memref<8x32xf32, #tpu.memory_space<vmem>>, vector<8x32xf32>
    tpu.vector_store %arg12[%c0_100, %c0_101], %151 {strides = array<i32>} : memref<8x32xf32, #tpu.memory_space<vmem>>, vector<8x32xf32>,
    %c40_102 = arith.constant 40 : index
    %c0_103 = arith.constant 0 : index
    %154 = vector.load %arg11[%c40_102, %c0_103] : memref<64x32xf32, #tpu.memory_space<vmem>>, vector<8x32xf32>
    tpu.vector_store %arg11[%c40_102, %c0_103], %151 {strides = array<i32>} : memref<64x32xf32, #tpu.memory_space<vmem>>, vector<8x32xf32>,
    %c48 = arith.constant 48 : index
    %c0_104 = arith.constant 0 : index
    %155 = vector.load %arg10[%c48, %c0_104] : memref<64x128xf32, #tpu.memory_space<vmem>>, vector<8x128xf32>
    %c0_105 = arith.constant 0 : index
    %c0_106 = arith.constant 0 : index
    %156 = vector.load %arg12[%c0_105, %c0_106] : memref<8x32xf32, #tpu.memory_space<vmem>>, vector<8x32xf32>
    %c0_107 = arith.constant 0 : index
    %c0_108 = arith.constant 0 : index
    %157 = vector.load %arg2[%c0_107, %c0_108] : memref<32x128xf32, #tpu.memory_space<vmem>>, vector<32x128xf32>
    %cst_109 = arith.constant dense<0.000000e+00> : vector<8x128xf32>
    %158 = tpu.matmul %156, %157, %cst_109 {dimension_numbers = #tpu.dot_dimension_numbers<[1], [0], [0], [1], [0, 0, 1, 1], [], []>} : vector<8x32xf32>, vector<32x128xf32>, vector<8x128xf32> -> vector<8x128xf32>
    %159 = arith.addf %155, %158 : vector<8x128xf32>
    %160 = arith.negf %159 : vector<8x128xf32>
    %161 = math.exp %160 : vector<8x128xf32>
    %cst_110 = arith.constant 1.000000e+00 : f32
    %162 = vector.broadcast %cst_110 : f32 to vector<8x128xf32>
    %163 = arith.addf %162, %161 : vector<8x128xf32>
    %164 = arith.divf %162, %163 : vector<8x128xf32>
    %165 = math.tanh %159 : vector<8x128xf32>
    %166 = vector.extract_strided_slice %164 {offsets = [0, 0], sizes = [8, 32], strides = [1, 1]} : vector<8x128xf32> to vector<8x32xf32>
    %167 = vector.extract_strided_slice %164 {offsets = [0, 32], sizes = [8, 32], strides = [1, 1]} : vector<8x128xf32> to vector<8x32xf32>
    %168 = vector.extract_strided_slice %164 {offsets = [0, 96], sizes = [8, 32], strides = [1, 1]} : vector<8x128xf32> to vector<8x32xf32>
    %169 = vector.extract_strided_slice %165 {offsets = [0, 64], sizes = [8, 32], strides = [1, 1]} : vector<8x128xf32> to vector<8x32xf32>
    %c0_111 = arith.constant 0 : index
    %c0_112 = arith.constant 0 : index
    %170 = vector.load %arg13[%c0_111, %c0_112] : memref<8x32xf32, #tpu.memory_space<vmem>>, vector<8x32xf32>
    %171 = arith.mulf %167, %170 : vector<8x32xf32>
    %172 = arith.mulf %166, %169 : vector<8x32xf32>
    %173 = arith.addf %171, %172 : vector<8x32xf32>
    %174 = math.tanh %173 : vector<8x32xf32>
    %175 = arith.mulf %168, %174 : vector<8x32xf32>
    %c0_113 = arith.constant 0 : index
    %c0_114 = arith.constant 0 : index
    %176 = vector.load %arg13[%c0_113, %c0_114] : memref<8x32xf32, #tpu.memory_space<vmem>>, vector<8x32xf32>
    tpu.vector_store %arg13[%c0_113, %c0_114], %173 {strides = array<i32>} : memref<8x32xf32, #tpu.memory_space<vmem>>, vector<8x32xf32>,
    %c0_115 = arith.constant 0 : index
    %c0_116 = arith.constant 0 : index
    %177 = vector.load %arg12[%c0_115, %c0_116] : memref<8x32xf32, #tpu.memory_space<vmem>>, vector<8x32xf32>
    tpu.vector_store %arg12[%c0_115, %c0_116], %175 {strides = array<i32>} : memref<8x32xf32, #tpu.memory_space<vmem>>, vector<8x32xf32>,
    %c48_117 = arith.constant 48 : index
    %c0_118 = arith.constant 0 : index
    %178 = vector.load %arg11[%c48_117, %c0_118] : memref<64x32xf32, #tpu.memory_space<vmem>>, vector<8x32xf32>
    tpu.vector_store %arg11[%c48_117, %c0_118], %175 {strides = array<i32>} : memref<64x32xf32, #tpu.memory_space<vmem>>, vector<8x32xf32>,
    %c56 = arith.constant 56 : index
    %c0_119 = arith.constant 0 : index
    %179 = vector.load %arg10[%c56, %c0_119] : memref<64x128xf32, #tpu.memory_space<vmem>>, vector<8x128xf32>
    %c0_120 = arith.constant 0 : index
    %c0_121 = arith.constant 0 : index
    %180 = vector.load %arg12[%c0_120, %c0_121] : memref<8x32xf32, #tpu.memory_space<vmem>>, vector<8x32xf32>
    %c0_122 = arith.constant 0 : index
    %c0_123 = arith.constant 0 : index
    %181 = vector.load %arg2[%c0_122, %c0_123] : memref<32x128xf32, #tpu.memory_space<vmem>>, vector<32x128xf32>
    %cst_124 = arith.constant dense<0.000000e+00> : vector<8x128xf32>
    %182 = tpu.matmul %180, %181, %cst_124 {dimension_numbers = #tpu.dot_dimension_numbers<[1], [0], [0], [1], [0, 0, 1, 1], [], []>} : vector<8x32xf32>, vector<32x128xf32>, vector<8x128xf32> -> vector<8x128xf32>
    %183 = arith.addf %179, %182 : vector<8x128xf32>
    %184 = arith.negf %183 : vector<8x128xf32>
    %185 = math.exp %184 : vector<8x128xf32>
    %cst_125 = arith.constant 1.000000e+00 : f32
    %186 = vector.broadcast %cst_125 : f32 to vector<8x128xf32>
    %187 = arith.addf %186, %185 : vector<8x128xf32>
    %188 = arith.divf %186, %187 : vector<8x128xf32>
    %189 = math.tanh %183 : vector<8x128xf32>
    %190 = vector.extract_strided_slice %188 {offsets = [0, 0], sizes = [8, 32], strides = [1, 1]} : vector<8x128xf32> to vector<8x32xf32>
    %191 = vector.extract_strided_slice %188 {offsets = [0, 32], sizes = [8, 32], strides = [1, 1]} : vector<8x128xf32> to vector<8x32xf32>
    %192 = vector.extract_strided_slice %188 {offsets = [0, 96], sizes = [8, 32], strides = [1, 1]} : vector<8x128xf32> to vector<8x32xf32>
    %193 = vector.extract_strided_slice %189 {offsets = [0, 64], sizes = [8, 32], strides = [1, 1]} : vector<8x128xf32> to vector<8x32xf32>
    %c0_126 = arith.constant 0 : index
    %c0_127 = arith.constant 0 : index
    %194 = vector.load %arg13[%c0_126, %c0_127] : memref<8x32xf32, #tpu.memory_space<vmem>>, vector<8x32xf32>
    %195 = arith.mulf %191, %194 : vector<8x32xf32>
    %196 = arith.mulf %190, %193 : vector<8x32xf32>
    %197 = arith.addf %195, %196 : vector<8x32xf32>
    %198 = math.tanh %197 : vector<8x32xf32>
    %199 = arith.mulf %192, %198 : vector<8x32xf32>
    %c0_128 = arith.constant 0 : index
    %c0_129 = arith.constant 0 : index
    %200 = vector.load %arg13[%c0_128, %c0_129] : memref<8x32xf32, #tpu.memory_space<vmem>>, vector<8x32xf32>
    tpu.vector_store %arg13[%c0_128, %c0_129], %197 {strides = array<i32>} : memref<8x32xf32, #tpu.memory_space<vmem>>, vector<8x32xf32>,
    %c0_130 = arith.constant 0 : index
    %c0_131 = arith.constant 0 : index
    %201 = vector.load %arg12[%c0_130, %c0_131] : memref<8x32xf32, #tpu.memory_space<vmem>>, vector<8x32xf32>
    tpu.vector_store %arg12[%c0_130, %c0_131], %199 {strides = array<i32>} : memref<8x32xf32, #tpu.memory_space<vmem>>, vector<8x32xf32>,
    %c56_132 = arith.constant 56 : index
    %c0_133 = arith.constant 0 : index
    %202 = vector.load %arg11[%c56_132, %c0_133] : memref<64x32xf32, #tpu.memory_space<vmem>>, vector<8x32xf32>
    tpu.vector_store %arg11[%c56_132, %c0_133], %199 {strides = array<i32>} : memref<64x32xf32, #tpu.memory_space<vmem>>, vector<8x32xf32>,
    %c0_134 = arith.constant 0 : index
    %c0_135 = arith.constant 0 : index
    %203 = vector.load %arg11[%c0_134, %c0_135] : memref<64x32xf32, #tpu.memory_space<vmem>>, vector<64x32xf32>
    %c0_136 = arith.constant 0 : index
    %c0_137 = arith.constant 0 : index
    %204 = vector.load %arg4[%c0_136, %c0_137] : memref<32x128xf32, #tpu.memory_space<vmem>>, vector<32x128xf32>
    %cst_138 = arith.constant dense<0.000000e+00> : vector<64x128xf32>
    %205 = tpu.matmul %203, %204, %cst_138 {dimension_numbers = #tpu.dot_dimension_numbers<[1], [0], [0], [1], [0, 0, 1, 1], [], []>} : vector<64x32xf32>, vector<32x128xf32>, vector<64x128xf32> -> vector<64x128xf32>
    %c0_139 = arith.constant 0 : index
    %c0_140 = arith.constant 0 : index
    %206 = vector.load %arg6[%c0_139, %c0_140] : memref<1x128xf32, #tpu.memory_space<vmem>>, vector<1x128xf32>
    %207 = vector.broadcast %206 : vector<1x128xf32> to vector<64x128xf32>
    %208 = arith.addf %205, %207 : vector<64x128xf32>
    %c0_141 = arith.constant 0 : index
    %c0_142 = arith.constant 0 : index
    %209 = vector.load %arg10[%c0_141, %c0_142] : memref<64x128xf32, #tpu.memory_space<vmem>>, vector<64x128xf32>
    tpu.vector_store %arg10[%c0_141, %c0_142], %208 {strides = array<i32>} : memref<64x128xf32, #tpu.memory_space<vmem>>, vector<64x128xf32>,
    %cst_143 = arith.constant 0.000000e+00 : f32
    %210 = vector.broadcast %cst_143 : f32 to vector<8x32xf32>
    %c0_144 = arith.constant 0 : index
    %c0_145 = arith.constant 0 : index
    %211 = vector.load %arg12[%c0_144, %c0_145] : memref<8x32xf32, #tpu.memory_space<vmem>>, vector<8x32xf32>
    tpu.vector_store %arg12[%c0_144, %c0_145], %210 {strides = array<i32>} : memref<8x32xf32, #tpu.memory_space<vmem>>, vector<8x32xf32>,
    %cst_146 = arith.constant 0.000000e+00 : f32
    %212 = vector.broadcast %cst_146 : f32 to vector<8x32xf32>
    %c0_147 = arith.constant 0 : index
    %c0_148 = arith.constant 0 : index
    %213 = vector.load %arg13[%c0_147, %c0_148] : memref<8x32xf32, #tpu.memory_space<vmem>>, vector<8x32xf32>
    tpu.vector_store %arg13[%c0_147, %c0_148], %212 {strides = array<i32>} : memref<8x32xf32, #tpu.memory_space<vmem>>, vector<8x32xf32>,
    %c0_149 = arith.constant 0 : index
    %c0_150 = arith.constant 0 : index
    %214 = vector.load %arg10[%c0_149, %c0_150] : memref<64x128xf32, #tpu.memory_space<vmem>>, vector<8x128xf32>
    %c0_151 = arith.constant 0 : index
    %c0_152 = arith.constant 0 : index
    %215 = vector.load %arg12[%c0_151, %c0_152] : memref<8x32xf32, #tpu.memory_space<vmem>>, vector<8x32xf32>
    %c0_153 = arith.constant 0 : index
    %c0_154 = arith.constant 0 : index
    %216 = vector.load %arg5[%c0_153, %c0_154] : memref<32x128xf32, #tpu.memory_space<vmem>>, vector<32x128xf32>
    %cst_155 = arith.constant dense<0.000000e+00> : vector<8x128xf32>
    %217 = tpu.matmul %215, %216, %cst_155 {dimension_numbers = #tpu.dot_dimension_numbers<[1], [0], [0], [1], [0, 0, 1, 1], [], []>} : vector<8x32xf32>, vector<32x128xf32>, vector<8x128xf32> -> vector<8x128xf32>
    %218 = arith.addf %214, %217 : vector<8x128xf32>
    %219 = arith.negf %218 : vector<8x128xf32>
    %220 = math.exp %219 : vector<8x128xf32>
    %cst_156 = arith.constant 1.000000e+00 : f32
    %221 = vector.broadcast %cst_156 : f32 to vector<8x128xf32>
    %222 = arith.addf %221, %220 : vector<8x128xf32>
    %223 = arith.divf %221, %222 : vector<8x128xf32>
    %224 = math.tanh %218 : vector<8x128xf32>
    %225 = vector.extract_strided_slice %223 {offsets = [0, 0], sizes = [8, 32], strides = [1, 1]} : vector<8x128xf32> to vector<8x32xf32>
    %226 = vector.extract_strided_slice %223 {offsets = [0, 32], sizes = [8, 32], strides = [1, 1]} : vector<8x128xf32> to vector<8x32xf32>
    %227 = vector.extract_strided_slice %223 {offsets = [0, 96], sizes = [8, 32], strides = [1, 1]} : vector<8x128xf32> to vector<8x32xf32>
    %228 = vector.extract_strided_slice %224 {offsets = [0, 64], sizes = [8, 32], strides = [1, 1]} : vector<8x128xf32> to vector<8x32xf32>
    %c0_157 = arith.constant 0 : index
    %c0_158 = arith.constant 0 : index
    %229 = vector.load %arg13[%c0_157, %c0_158] : memref<8x32xf32, #tpu.memory_space<vmem>>, vector<8x32xf32>
    %230 = arith.mulf %226, %229 : vector<8x32xf32>
    %231 = arith.mulf %225, %228 : vector<8x32xf32>
    %232 = arith.addf %230, %231 : vector<8x32xf32>
    %233 = math.tanh %232 : vector<8x32xf32>
    %234 = arith.mulf %227, %233 : vector<8x32xf32>
    %c0_159 = arith.constant 0 : index
    %c0_160 = arith.constant 0 : index
    %235 = vector.load %arg13[%c0_159, %c0_160] : memref<8x32xf32, #tpu.memory_space<vmem>>, vector<8x32xf32>
    tpu.vector_store %arg13[%c0_159, %c0_160], %232 {strides = array<i32>} : memref<8x32xf32, #tpu.memory_space<vmem>>, vector<8x32xf32>,
    %c0_161 = arith.constant 0 : index
    %c0_162 = arith.constant 0 : index
    %236 = vector.load %arg12[%c0_161, %c0_162] : memref<8x32xf32, #tpu.memory_space<vmem>>, vector<8x32xf32>
    tpu.vector_store %arg12[%c0_161, %c0_162], %234 {strides = array<i32>} : memref<8x32xf32, #tpu.memory_space<vmem>>, vector<8x32xf32>,
    %c8_163 = arith.constant 8 : index
    %c0_164 = arith.constant 0 : index
    %237 = vector.load %arg10[%c8_163, %c0_164] : memref<64x128xf32, #tpu.memory_space<vmem>>, vector<8x128xf32>
    %c0_165 = arith.constant 0 : index
    %c0_166 = arith.constant 0 : index
    %238 = vector.load %arg12[%c0_165, %c0_166] : memref<8x32xf32, #tpu.memory_space<vmem>>, vector<8x32xf32>
    %c0_167 = arith.constant 0 : index
    %c0_168 = arith.constant 0 : index
    %239 = vector.load %arg5[%c0_167, %c0_168] : memref<32x128xf32, #tpu.memory_space<vmem>>, vector<32x128xf32>
    %cst_169 = arith.constant dense<0.000000e+00> : vector<8x128xf32>
    %240 = tpu.matmul %238, %239, %cst_169 {dimension_numbers = #tpu.dot_dimension_numbers<[1], [0], [0], [1], [0, 0, 1, 1], [], []>} : vector<8x32xf32>, vector<32x128xf32>, vector<8x128xf32> -> vector<8x128xf32>
    %241 = arith.addf %237, %240 : vector<8x128xf32>
    %242 = arith.negf %241 : vector<8x128xf32>
    %243 = math.exp %242 : vector<8x128xf32>
    %cst_170 = arith.constant 1.000000e+00 : f32
    %244 = vector.broadcast %cst_170 : f32 to vector<8x128xf32>
    %245 = arith.addf %244, %243 : vector<8x128xf32>
    %246 = arith.divf %244, %245 : vector<8x128xf32>
    %247 = math.tanh %241 : vector<8x128xf32>
    %248 = vector.extract_strided_slice %246 {offsets = [0, 0], sizes = [8, 32], strides = [1, 1]} : vector<8x128xf32> to vector<8x32xf32>
    %249 = vector.extract_strided_slice %246 {offsets = [0, 32], sizes = [8, 32], strides = [1, 1]} : vector<8x128xf32> to vector<8x32xf32>
    %250 = vector.extract_strided_slice %246 {offsets = [0, 96], sizes = [8, 32], strides = [1, 1]} : vector<8x128xf32> to vector<8x32xf32>
    %251 = vector.extract_strided_slice %247 {offsets = [0, 64], sizes = [8, 32], strides = [1, 1]} : vector<8x128xf32> to vector<8x32xf32>
    %c0_171 = arith.constant 0 : index
    %c0_172 = arith.constant 0 : index
    %252 = vector.load %arg13[%c0_171, %c0_172] : memref<8x32xf32, #tpu.memory_space<vmem>>, vector<8x32xf32>
    %253 = arith.mulf %249, %252 : vector<8x32xf32>
    %254 = arith.mulf %248, %251 : vector<8x32xf32>
    %255 = arith.addf %253, %254 : vector<8x32xf32>
    %256 = math.tanh %255 : vector<8x32xf32>
    %257 = arith.mulf %250, %256 : vector<8x32xf32>
    %c0_173 = arith.constant 0 : index
    %c0_174 = arith.constant 0 : index
    %258 = vector.load %arg13[%c0_173, %c0_174] : memref<8x32xf32, #tpu.memory_space<vmem>>, vector<8x32xf32>
    tpu.vector_store %arg13[%c0_173, %c0_174], %255 {strides = array<i32>} : memref<8x32xf32, #tpu.memory_space<vmem>>, vector<8x32xf32>,
    %c0_175 = arith.constant 0 : index
    %c0_176 = arith.constant 0 : index
    %259 = vector.load %arg12[%c0_175, %c0_176] : memref<8x32xf32, #tpu.memory_space<vmem>>, vector<8x32xf32>
    tpu.vector_store %arg12[%c0_175, %c0_176], %257 {strides = array<i32>} : memref<8x32xf32, #tpu.memory_space<vmem>>, vector<8x32xf32>,
    %c16_177 = arith.constant 16 : index
    %c0_178 = arith.constant 0 : index
    %260 = vector.load %arg10[%c16_177, %c0_178] : memref<64x128xf32, #tpu.memory_space<vmem>>, vector<8x128xf32>
    %c0_179 = arith.constant 0 : index
    %c0_180 = arith.constant 0 : index
    %261 = vector.load %arg12[%c0_179, %c0_180] : memref<8x32xf32, #tpu.memory_space<vmem>>, vector<8x32xf32>
    %c0_181 = arith.constant 0 : index
    %c0_182 = arith.constant 0 : index
    %262 = vector.load %arg5[%c0_181, %c0_182] : memref<32x128xf32, #tpu.memory_space<vmem>>, vector<32x128xf32>
    %cst_183 = arith.constant dense<0.000000e+00> : vector<8x128xf32>
    %263 = tpu.matmul %261, %262, %cst_183 {dimension_numbers = #tpu.dot_dimension_numbers<[1], [0], [0], [1], [0, 0, 1, 1], [], []>} : vector<8x32xf32>, vector<32x128xf32>, vector<8x128xf32> -> vector<8x128xf32>
    %264 = arith.addf %260, %263 : vector<8x128xf32>
    %265 = arith.negf %264 : vector<8x128xf32>
    %266 = math.exp %265 : vector<8x128xf32>
    %cst_184 = arith.constant 1.000000e+00 : f32
    %267 = vector.broadcast %cst_184 : f32 to vector<8x128xf32>
    %268 = arith.addf %267, %266 : vector<8x128xf32>
    %269 = arith.divf %267, %268 : vector<8x128xf32>
    %270 = math.tanh %264 : vector<8x128xf32>
    %271 = vector.extract_strided_slice %269 {offsets = [0, 0], sizes = [8, 32], strides = [1, 1]} : vector<8x128xf32> to vector<8x32xf32>
    %272 = vector.extract_strided_slice %269 {offsets = [0, 32], sizes = [8, 32], strides = [1, 1]} : vector<8x128xf32> to vector<8x32xf32>
    %273 = vector.extract_strided_slice %269 {offsets = [0, 96], sizes = [8, 32], strides = [1, 1]} : vector<8x128xf32> to vector<8x32xf32>
    %274 = vector.extract_strided_slice %270 {offsets = [0, 64], sizes = [8, 32], strides = [1, 1]} : vector<8x128xf32> to vector<8x32xf32>
    %c0_185 = arith.constant 0 : index
    %c0_186 = arith.constant 0 : index
    %275 = vector.load %arg13[%c0_185, %c0_186] : memref<8x32xf32, #tpu.memory_space<vmem>>, vector<8x32xf32>
    %276 = arith.mulf %272, %275 : vector<8x32xf32>
    %277 = arith.mulf %271, %274 : vector<8x32xf32>
    %278 = arith.addf %276, %277 : vector<8x32xf32>
    %279 = math.tanh %278 : vector<8x32xf32>
    %280 = arith.mulf %273, %279 : vector<8x32xf32>
    %c0_187 = arith.constant 0 : index
    %c0_188 = arith.constant 0 : index
    %281 = vector.load %arg13[%c0_187, %c0_188] : memref<8x32xf32, #tpu.memory_space<vmem>>, vector<8x32xf32>
    tpu.vector_store %arg13[%c0_187, %c0_188], %278 {strides = array<i32>} : memref<8x32xf32, #tpu.memory_space<vmem>>, vector<8x32xf32>,
    %c0_189 = arith.constant 0 : index
    %c0_190 = arith.constant 0 : index
    %282 = vector.load %arg12[%c0_189, %c0_190] : memref<8x32xf32, #tpu.memory_space<vmem>>, vector<8x32xf32>
    tpu.vector_store %arg12[%c0_189, %c0_190], %280 {strides = array<i32>} : memref<8x32xf32, #tpu.memory_space<vmem>>, vector<8x32xf32>,
    %c24_191 = arith.constant 24 : index
    %c0_192 = arith.constant 0 : index
    %283 = vector.load %arg10[%c24_191, %c0_192] : memref<64x128xf32, #tpu.memory_space<vmem>>, vector<8x128xf32>
    %c0_193 = arith.constant 0 : index
    %c0_194 = arith.constant 0 : index
    %284 = vector.load %arg12[%c0_193, %c0_194] : memref<8x32xf32, #tpu.memory_space<vmem>>, vector<8x32xf32>
    %c0_195 = arith.constant 0 : index
    %c0_196 = arith.constant 0 : index
    %285 = vector.load %arg5[%c0_195, %c0_196] : memref<32x128xf32, #tpu.memory_space<vmem>>, vector<32x128xf32>
    %cst_197 = arith.constant dense<0.000000e+00> : vector<8x128xf32>
    %286 = tpu.matmul %284, %285, %cst_197 {dimension_numbers = #tpu.dot_dimension_numbers<[1], [0], [0], [1], [0, 0, 1, 1], [], []>} : vector<8x32xf32>, vector<32x128xf32>, vector<8x128xf32> -> vector<8x128xf32>
    %287 = arith.addf %283, %286 : vector<8x128xf32>
    %288 = arith.negf %287 : vector<8x128xf32>
    %289 = math.exp %288 : vector<8x128xf32>
    %cst_198 = arith.constant 1.000000e+00 : f32
    %290 = vector.broadcast %cst_198 : f32 to vector<8x128xf32>
    %291 = arith.addf %290, %289 : vector<8x128xf32>
    %292 = arith.divf %290, %291 : vector<8x128xf32>
    %293 = math.tanh %287 : vector<8x128xf32>
    %294 = vector.extract_strided_slice %292 {offsets = [0, 0], sizes = [8, 32], strides = [1, 1]} : vector<8x128xf32> to vector<8x32xf32>
    %295 = vector.extract_strided_slice %292 {offsets = [0, 32], sizes = [8, 32], strides = [1, 1]} : vector<8x128xf32> to vector<8x32xf32>
    %296 = vector.extract_strided_slice %292 {offsets = [0, 96], sizes = [8, 32], strides = [1, 1]} : vector<8x128xf32> to vector<8x32xf32>
    %297 = vector.extract_strided_slice %293 {offsets = [0, 64], sizes = [8, 32], strides = [1, 1]} : vector<8x128xf32> to vector<8x32xf32>
    %c0_199 = arith.constant 0 : index
    %c0_200 = arith.constant 0 : index
    %298 = vector.load %arg13[%c0_199, %c0_200] : memref<8x32xf32, #tpu.memory_space<vmem>>, vector<8x32xf32>
    %299 = arith.mulf %295, %298 : vector<8x32xf32>
    %300 = arith.mulf %294, %297 : vector<8x32xf32>
    %301 = arith.addf %299, %300 : vector<8x32xf32>
    %302 = math.tanh %301 : vector<8x32xf32>
    %303 = arith.mulf %296, %302 : vector<8x32xf32>
    %c0_201 = arith.constant 0 : index
    %c0_202 = arith.constant 0 : index
    %304 = vector.load %arg13[%c0_201, %c0_202] : memref<8x32xf32, #tpu.memory_space<vmem>>, vector<8x32xf32>
    tpu.vector_store %arg13[%c0_201, %c0_202], %301 {strides = array<i32>} : memref<8x32xf32, #tpu.memory_space<vmem>>, vector<8x32xf32>,
    %c0_203 = arith.constant 0 : index
    %c0_204 = arith.constant 0 : index
    %305 = vector.load %arg12[%c0_203, %c0_204] : memref<8x32xf32, #tpu.memory_space<vmem>>, vector<8x32xf32>
    tpu.vector_store %arg12[%c0_203, %c0_204], %303 {strides = array<i32>} : memref<8x32xf32, #tpu.memory_space<vmem>>, vector<8x32xf32>,
    %c32_205 = arith.constant 32 : index
    %c0_206 = arith.constant 0 : index
    %306 = vector.load %arg10[%c32_205, %c0_206] : memref<64x128xf32, #tpu.memory_space<vmem>>, vector<8x128xf32>
    %c0_207 = arith.constant 0 : index
    %c0_208 = arith.constant 0 : index
    %307 = vector.load %arg12[%c0_207, %c0_208] : memref<8x32xf32, #tpu.memory_space<vmem>>, vector<8x32xf32>
    %c0_209 = arith.constant 0 : index
    %c0_210 = arith.constant 0 : index
    %308 = vector.load %arg5[%c0_209, %c0_210] : memref<32x128xf32, #tpu.memory_space<vmem>>, vector<32x128xf32>
    %cst_211 = arith.constant dense<0.000000e+00> : vector<8x128xf32>
    %309 = tpu.matmul %307, %308, %cst_211 {dimension_numbers = #tpu.dot_dimension_numbers<[1], [0], [0], [1], [0, 0, 1, 1], [], []>} : vector<8x32xf32>, vector<32x128xf32>, vector<8x128xf32> -> vector<8x128xf32>
    %310 = arith.addf %306, %309 : vector<8x128xf32>
    %311 = arith.negf %310 : vector<8x128xf32>
    %312 = math.exp %311 : vector<8x128xf32>
    %cst_212 = arith.constant 1.000000e+00 : f32
    %313 = vector.broadcast %cst_212 : f32 to vector<8x128xf32>
    %314 = arith.addf %313, %312 : vector<8x128xf32>
    %315 = arith.divf %313, %314 : vector<8x128xf32>
    %316 = math.tanh %310 : vector<8x128xf32>
    %317 = vector.extract_strided_slice %315 {offsets = [0, 0], sizes = [8, 32], strides = [1, 1]} : vector<8x128xf32> to vector<8x32xf32>
    %318 = vector.extract_strided_slice %315 {offsets = [0, 32], sizes = [8, 32], strides = [1, 1]} : vector<8x128xf32> to vector<8x32xf32>
    %319 = vector.extract_strided_slice %315 {offsets = [0, 96], sizes = [8, 32], strides = [1, 1]} : vector<8x128xf32> to vector<8x32xf32>
    %320 = vector.extract_strided_slice %316 {offsets = [0, 64], sizes = [8, 32], strides = [1, 1]} : vector<8x128xf32> to vector<8x32xf32>
    %c0_213 = arith.constant 0 : index
    %c0_214 = arith.constant 0 : index
    %321 = vector.load %arg13[%c0_213, %c0_214] : memref<8x32xf32, #tpu.memory_space<vmem>>, vector<8x32xf32>
    %322 = arith.mulf %318, %321 : vector<8x32xf32>
    %323 = arith.mulf %317, %320 : vector<8x32xf32>
    %324 = arith.addf %322, %323 : vector<8x32xf32>
    %325 = math.tanh %324 : vector<8x32xf32>
    %326 = arith.mulf %319, %325 : vector<8x32xf32>
    %c0_215 = arith.constant 0 : index
    %c0_216 = arith.constant 0 : index
    %327 = vector.load %arg13[%c0_215, %c0_216] : memref<8x32xf32, #tpu.memory_space<vmem>>, vector<8x32xf32>
    tpu.vector_store %arg13[%c0_215, %c0_216], %324 {strides = array<i32>} : memref<8x32xf32, #tpu.memory_space<vmem>>, vector<8x32xf32>,
    %c0_217 = arith.constant 0 : index
    %c0_218 = arith.constant 0 : index
    %328 = vector.load %arg12[%c0_217, %c0_218] : memref<8x32xf32, #tpu.memory_space<vmem>>, vector<8x32xf32>
    tpu.vector_store %arg12[%c0_217, %c0_218], %326 {strides = array<i32>} : memref<8x32xf32, #tpu.memory_space<vmem>>, vector<8x32xf32>,
    %c40_219 = arith.constant 40 : index
    %c0_220 = arith.constant 0 : index
    %329 = vector.load %arg10[%c40_219, %c0_220] : memref<64x128xf32, #tpu.memory_space<vmem>>, vector<8x128xf32>
    %c0_221 = arith.constant 0 : index
    %c0_222 = arith.constant 0 : index
    %330 = vector.load %arg12[%c0_221, %c0_222] : memref<8x32xf32, #tpu.memory_space<vmem>>, vector<8x32xf32>
    %c0_223 = arith.constant 0 : index
    %c0_224 = arith.constant 0 : index
    %331 = vector.load %arg5[%c0_223, %c0_224] : memref<32x128xf32, #tpu.memory_space<vmem>>, vector<32x128xf32>
    %cst_225 = arith.constant dense<0.000000e+00> : vector<8x128xf32>
    %332 = tpu.matmul %330, %331, %cst_225 {dimension_numbers = #tpu.dot_dimension_numbers<[1], [0], [0], [1], [0, 0, 1, 1], [], []>} : vector<8x32xf32>, vector<32x128xf32>, vector<8x128xf32> -> vector<8x128xf32>
    %333 = arith.addf %329, %332 : vector<8x128xf32>
    %334 = arith.negf %333 : vector<8x128xf32>
    %335 = math.exp %334 : vector<8x128xf32>
    %cst_226 = arith.constant 1.000000e+00 : f32
    %336 = vector.broadcast %cst_226 : f32 to vector<8x128xf32>
    %337 = arith.addf %336, %335 : vector<8x128xf32>
    %338 = arith.divf %336, %337 : vector<8x128xf32>
    %339 = math.tanh %333 : vector<8x128xf32>
    %340 = vector.extract_strided_slice %338 {offsets = [0, 0], sizes = [8, 32], strides = [1, 1]} : vector<8x128xf32> to vector<8x32xf32>
    %341 = vector.extract_strided_slice %338 {offsets = [0, 32], sizes = [8, 32], strides = [1, 1]} : vector<8x128xf32> to vector<8x32xf32>
    %342 = vector.extract_strided_slice %338 {offsets = [0, 96], sizes = [8, 32], strides = [1, 1]} : vector<8x128xf32> to vector<8x32xf32>
    %343 = vector.extract_strided_slice %339 {offsets = [0, 64], sizes = [8, 32], strides = [1, 1]} : vector<8x128xf32> to vector<8x32xf32>
    %c0_227 = arith.constant 0 : index
    %c0_228 = arith.constant 0 : index
    %344 = vector.load %arg13[%c0_227, %c0_228] : memref<8x32xf32, #tpu.memory_space<vmem>>, vector<8x32xf32>
    %345 = arith.mulf %341, %344 : vector<8x32xf32>
    %346 = arith.mulf %340, %343 : vector<8x32xf32>
    %347 = arith.addf %345, %346 : vector<8x32xf32>
    %348 = math.tanh %347 : vector<8x32xf32>
    %349 = arith.mulf %342, %348 : vector<8x32xf32>
    %c0_229 = arith.constant 0 : index
    %c0_230 = arith.constant 0 : index
    %350 = vector.load %arg13[%c0_229, %c0_230] : memref<8x32xf32, #tpu.memory_space<vmem>>, vector<8x32xf32>
    tpu.vector_store %arg13[%c0_229, %c0_230], %347 {strides = array<i32>} : memref<8x32xf32, #tpu.memory_space<vmem>>, vector<8x32xf32>,
    %c0_231 = arith.constant 0 : index
    %c0_232 = arith.constant 0 : index
    %351 = vector.load %arg12[%c0_231, %c0_232] : memref<8x32xf32, #tpu.memory_space<vmem>>, vector<8x32xf32>
    tpu.vector_store %arg12[%c0_231, %c0_232], %349 {strides = array<i32>} : memref<8x32xf32, #tpu.memory_space<vmem>>, vector<8x32xf32>,
    %c48_233 = arith.constant 48 : index
    %c0_234 = arith.constant 0 : index
    %352 = vector.load %arg10[%c48_233, %c0_234] : memref<64x128xf32, #tpu.memory_space<vmem>>, vector<8x128xf32>
    %c0_235 = arith.constant 0 : index
    %c0_236 = arith.constant 0 : index
    %353 = vector.load %arg12[%c0_235, %c0_236] : memref<8x32xf32, #tpu.memory_space<vmem>>, vector<8x32xf32>
    %c0_237 = arith.constant 0 : index
    %c0_238 = arith.constant 0 : index
    %354 = vector.load %arg5[%c0_237, %c0_238] : memref<32x128xf32, #tpu.memory_space<vmem>>, vector<32x128xf32>
    %cst_239 = arith.constant dense<0.000000e+00> : vector<8x128xf32>
    %355 = tpu.matmul %353, %354, %cst_239 {dimension_numbers = #tpu.dot_dimension_numbers<[1], [0], [0], [1], [0, 0, 1, 1], [], []>} : vector<8x32xf32>, vector<32x128xf32>, vector<8x128xf32> -> vector<8x128xf32>
    %356 = arith.addf %352, %355 : vector<8x128xf32>
    %357 = arith.negf %356 : vector<8x128xf32>
    %358 = math.exp %357 : vector<8x128xf32>
    %cst_240 = arith.constant 1.000000e+00 : f32
    %359 = vector.broadcast %cst_240 : f32 to vector<8x128xf32>
    %360 = arith.addf %359, %358 : vector<8x128xf32>
    %361 = arith.divf %359, %360 : vector<8x128xf32>
    %362 = math.tanh %356 : vector<8x128xf32>
    %363 = vector.extract_strided_slice %361 {offsets = [0, 0], sizes = [8, 32], strides = [1, 1]} : vector<8x128xf32> to vector<8x32xf32>
    %364 = vector.extract_strided_slice %361 {offsets = [0, 32], sizes = [8, 32], strides = [1, 1]} : vector<8x128xf32> to vector<8x32xf32>
    %365 = vector.extract_strided_slice %361 {offsets = [0, 96], sizes = [8, 32], strides = [1, 1]} : vector<8x128xf32> to vector<8x32xf32>
    %366 = vector.extract_strided_slice %362 {offsets = [0, 64], sizes = [8, 32], strides = [1, 1]} : vector<8x128xf32> to vector<8x32xf32>
    %c0_241 = arith.constant 0 : index
    %c0_242 = arith.constant 0 : index
    %367 = vector.load %arg13[%c0_241, %c0_242] : memref<8x32xf32, #tpu.memory_space<vmem>>, vector<8x32xf32>
    %368 = arith.mulf %364, %367 : vector<8x32xf32>
    %369 = arith.mulf %363, %366 : vector<8x32xf32>
    %370 = arith.addf %368, %369 : vector<8x32xf32>
    %371 = math.tanh %370 : vector<8x32xf32>
    %372 = arith.mulf %365, %371 : vector<8x32xf32>
    %c0_243 = arith.constant 0 : index
    %c0_244 = arith.constant 0 : index
    %373 = vector.load %arg13[%c0_243, %c0_244] : memref<8x32xf32, #tpu.memory_space<vmem>>, vector<8x32xf32>
    tpu.vector_store %arg13[%c0_243, %c0_244], %370 {strides = array<i32>} : memref<8x32xf32, #tpu.memory_space<vmem>>, vector<8x32xf32>,
    %c0_245 = arith.constant 0 : index
    %c0_246 = arith.constant 0 : index
    %374 = vector.load %arg12[%c0_245, %c0_246] : memref<8x32xf32, #tpu.memory_space<vmem>>, vector<8x32xf32>
    tpu.vector_store %arg12[%c0_245, %c0_246], %372 {strides = array<i32>} : memref<8x32xf32, #tpu.memory_space<vmem>>, vector<8x32xf32>,
    %c56_247 = arith.constant 56 : index
    %c0_248 = arith.constant 0 : index
    %375 = vector.load %arg10[%c56_247, %c0_248] : memref<64x128xf32, #tpu.memory_space<vmem>>, vector<8x128xf32>
    %c0_249 = arith.constant 0 : index
    %c0_250 = arith.constant 0 : index
    %376 = vector.load %arg12[%c0_249, %c0_250] : memref<8x32xf32, #tpu.memory_space<vmem>>, vector<8x32xf32>
    %c0_251 = arith.constant 0 : index
    %c0_252 = arith.constant 0 : index
    %377 = vector.load %arg5[%c0_251, %c0_252] : memref<32x128xf32, #tpu.memory_space<vmem>>, vector<32x128xf32>
    %cst_253 = arith.constant dense<0.000000e+00> : vector<8x128xf32>
    %378 = tpu.matmul %376, %377, %cst_253 {dimension_numbers = #tpu.dot_dimension_numbers<[1], [0], [0], [1], [0, 0, 1, 1], [], []>} : vector<8x32xf32>, vector<32x128xf32>, vector<8x128xf32> -> vector<8x128xf32>
    %379 = arith.addf %375, %378 : vector<8x128xf32>
    %380 = arith.negf %379 : vector<8x128xf32>
    %381 = math.exp %380 : vector<8x128xf32>
    %cst_254 = arith.constant 1.000000e+00 : f32
    %382 = vector.broadcast %cst_254 : f32 to vector<8x128xf32>
    %383 = arith.addf %382, %381 : vector<8x128xf32>
    %384 = arith.divf %382, %383 : vector<8x128xf32>
    %385 = math.tanh %379 : vector<8x128xf32>
    %386 = vector.extract_strided_slice %384 {offsets = [0, 0], sizes = [8, 32], strides = [1, 1]} : vector<8x128xf32> to vector<8x32xf32>
    %387 = vector.extract_strided_slice %384 {offsets = [0, 32], sizes = [8, 32], strides = [1, 1]} : vector<8x128xf32> to vector<8x32xf32>
    %388 = vector.extract_strided_slice %384 {offsets = [0, 96], sizes = [8, 32], strides = [1, 1]} : vector<8x128xf32> to vector<8x32xf32>
    %389 = vector.extract_strided_slice %385 {offsets = [0, 64], sizes = [8, 32], strides = [1, 1]} : vector<8x128xf32> to vector<8x32xf32>
    %c0_255 = arith.constant 0 : index
    %c0_256 = arith.constant 0 : index
    %390 = vector.load %arg13[%c0_255, %c0_256] : memref<8x32xf32, #tpu.memory_space<vmem>>, vector<8x32xf32>
    %391 = arith.mulf %387, %390 : vector<8x32xf32>
    %392 = arith.mulf %386, %389 : vector<8x32xf32>
    %393 = arith.addf %391, %392 : vector<8x32xf32>
    %394 = math.tanh %393 : vector<8x32xf32>
    %395 = arith.mulf %388, %394 : vector<8x32xf32>
    %c0_257 = arith.constant 0 : index
    %c0_258 = arith.constant 0 : index
    %396 = vector.load %arg13[%c0_257, %c0_258] : memref<8x32xf32, #tpu.memory_space<vmem>>, vector<8x32xf32>
    tpu.vector_store %arg13[%c0_257, %c0_258], %393 {strides = array<i32>} : memref<8x32xf32, #tpu.memory_space<vmem>>, vector<8x32xf32>,
    %c0_259 = arith.constant 0 : index
    %c0_260 = arith.constant 0 : index
    %397 = vector.load %arg12[%c0_259, %c0_260] : memref<8x32xf32, #tpu.memory_space<vmem>>, vector<8x32xf32>
    tpu.vector_store %arg12[%c0_259, %c0_260], %395 {strides = array<i32>} : memref<8x32xf32, #tpu.memory_space<vmem>>, vector<8x32xf32>,
    %c0_261 = arith.constant 0 : index
    %c0_262 = arith.constant 0 : index
    %398 = vector.load %arg12[%c0_261, %c0_262] : memref<8x32xf32, #tpu.memory_space<vmem>>, vector<8x32xf32>
    %c0_263 = arith.constant 0 : index
    %c0_264 = arith.constant 0 : index
    %399 = vector.load %arg7[%c0_263, %c0_264] : memref<32x2xf32, #tpu.memory_space<vmem>>, vector<32x2xf32>
    %cst_265 = arith.constant dense<0.000000e+00> : vector<8x2xf32>
    %400 = tpu.matmul %398, %399, %cst_265 {dimension_numbers = #tpu.dot_dimension_numbers<[1], [0], [0], [1], [0, 0, 1, 1], [], []>} : vector<8x32xf32>, vector<32x2xf32>, vector<8x2xf32> -> vector<8x2xf32>
    %c0_266 = arith.constant 0 : index
    %c0_267 = arith.constant 0 : index
    %401 = vector.load %arg8[%c0_266, %c0_267] : memref<1x2xf32, #tpu.memory_space<vmem>>, vector<1x2xf32>
    %402 = vector.broadcast %401 : vector<1x2xf32> to vector<8x2xf32>
    %403 = arith.addf %400, %402 : vector<8x2xf32>
    %c0_268 = arith.constant 0 : index
    %c0_269 = arith.constant 0 : index
    %404 = vector.load %arg9[%c0_268, %c0_269] : memref<8x2xf32, #tpu.memory_space<vmem>>, vector<8x2xf32>
    tpu.vector_store %arg9[%c0_268, %c0_269], %403 {strides = array<i32>} : memref<8x2xf32, #tpu.memory_space<vmem>>, vector<8x2xf32>,
    return
  }
}

</mosaic_0001>

<bundles_post_ra>
// kernel: _pallas_lstm_forward.1
= control target key start
LH: loop header
LB: loop body
LE: loop exit
PB: predicated region body
PF: predicated region fallthrough
CT: control target
= control target key end

     0   :  { %vm49_vm0 = vcmask 130048   ;;  %v2981_v0 = vmov 0.0|0.0   ;;  %vm2982_vm1 = vmmov 0   ;;  %v2983_v4 = vmov 0.0   ;;  %s2984_s25 = smov 64   ;;  %s2985_s26 = smov 32   ;;  %s3468_s1 = inlined_call_operand.vmem [shape: f32[16,128], index: 1, kind: input, shape index: {}]   ;;  %s3469_s2 = inlined_call_operand.vmem [shape: f32[32,128], index: 2, kind: input, shape index: {}]   ;;  %s3470_s0 = inlined_call_operand.vmem [shape: f32[64,16], index: 0, kind: input, shape index: {}]   ;;  %s3471_s3 = inlined_call_operand.vmem [shape: f32[1,128], index: 3, kind: input, shape index: {}]   ;;  %s3472_s4 = inlined_call_operand.vmem [shape: f32[32,128], index: 4, kind: input, shape index: {}]   ;;  %s3473_s5 = inlined_call_operand.vmem [shape: f32[32,128], index: 5, kind: input, shape index: {}]   ;;  %s3474_s6 = inlined_call_operand.vmem [shape: f32[1,128], index: 6, kind: input, shape index: {}]   ;;  %s3475_s7 = inlined_call_operand.vmem [shape: f32[32,2], index: 7, kind: input, shape index: {}]   ;;  %s3476_s8 = inlined_call_operand.vmem [shape: f32[1,2], index: 8, kind: input, shape index: {}]   ;;  %s3477_s9 = inlined_call_operand.vmem [shape: f32[8,2], index: 9, kind: output, shape index: {}]  }
   0x1   :  { %2737 = vmatprep.subr.bf16.mxu1 %v2981_v0  ;;  %v40_v1 = vld [vmem:[%s3468_s1] sm:$0xff]  ;;  %v41_v2 = vld [vmem:[%s3468_s1 + $0x8] sm:$0xff]  ;;  %2534 = vmatprep.mubr.msk.f32.mxu1 %vm2982_vm1, %v2983_v4  ;;  %vm187_vm2 = vcmask 261120   ;;  %v194_v9 = vld [vmem:[%s3469_s2 + $0x10] sm:$0xff]  ;;  %vm2345_vm3 = vcmask 15360  }
   0x2   :  { %v192_v3 = vld [vmem:[%s3469_s2] sm:$0xff]  ;;  %v2733_v5 = vpack.c.bf16 %v41_v2, %v40_v1  ;;  %v193_v6 = vld [vmem:[%s3469_s2 + $0x8] sm:$0xff]  ;;  %188 = vst.msk [vmem:[#allocation4] sm:$0xff] %vm187_vm2, %v2983_v4  ;;  %189 = vst.msk [vmem:[#allocation5] sm:$0xff] %vm187_vm2, %v2983_v4 }
   0x3   :  { %v32_v7 = vld [vmem:[%s3470_s0] sm:$0xff]  ;;  %v3059_v8 = vpack.c.bf16 %v193_v6, %v192_v3  ;;  %v195_v10 = vld [vmem:[%s3469_s2 + $0x18] sm:$0xff]  ;;  %v33_v11 = vld [vmem:[%s3470_s0 + $0x8] sm:$0xff] }
   0x4   :  { %2514 = vmatprep.mubr.msk.f32.mxu0 %vm49_vm0, %v32_v7  ;;  %2734 = vmatprep.subr.bf16.mxu0 %v2733_v5  ;;  %v3072_v12 = vpack.c.bf16 %v195_v10, %v194_v9  ;;  %v3093_v14 = vld [vmem:[%s3471_s3] ss:$0 sm:$0xff]  ;;  %s2986_s3 = smov 96   ;;  %v34_v56 = vld [vmem:[%s3470_s0 + $0x10] sm:$0xff]  ;;  %v35_v57 = vld [vmem:[%s3470_s0 + $0x18] sm:$0xff] }
   0x5   :  { %2739 = vmatpush3.bf16.msra.mxu1 %v3059_v8  ;;  %2736 = vmatpush3.bf16.msra.mxu0 %v2733_v5  ;;  %v36_v58 = vld [vmem:[%s3470_s0 + $0x20] sm:$0xff]  ;;  %v37_v59 = vld [vmem:[%s3470_s0 + $0x28] sm:$0xff]  ;;  %v38_v60 = vld [vmem:[%s3470_s0 + $0x30] sm:$0xff] }
   0x6   :  { %2740 = vmatprep.subr.bf16.mxu1 %v2981_v0  ;;  %2749 = vmatprep.subr.bf16.mxu0 %v2981_v0  ;;  %v39_v61 = vld [vmem:[%s3470_s0 + $0x38] sm:$0xff] }
   0x8   :  { %2515 = vmatmul.mubr.msk.f32.vlgmr.msra.gmra.mrb[0].mxu0 %vm49_vm0, %v33_v11 }
   0x9   :  { %2742 = vmatpush3.bf16.msra.mxu1 %v3072_v12  ;;  %v191_v13 = vld [vmem:[#allocation4] sm:$0xff]  ;;  %2751 = vmatpush3.bf16.msra.mxu0 %v3059_v8  ;;  %v277_v22 = vld [vmem:[#allocation5] sm:$0xff] }
   0xa   :  { %2743 = vmatprep.subr.bf16.mxu1 %v2981_v0  ;;  %2752 = vmatprep.subr.bf16.mxu0 %v2981_v0 }
   0xb   :  { %2517 = vmatprep.mubr.msk.f32.mxu0 %vm49_vm0, %v34_v56 }
   0xc   :  { %2535 = vmatmul.mubr.msk.f32.vlgmr.msra.gmra.mrb[0].mxu1 %vm187_vm2, %v191_v13  ;;  %2518 = vmatmul.mubr.msk.f32.gmra.mrb[2].mxu0 %vm49_vm0, %v35_v57 }
   0xd   :  { %2745 = vmatpush3.bf16.msra.mxu1 %v3059_v8  ;;  %2545 = vmatprep.mubr.msk.f32.mxu1 %vm2982_vm1, %v2983_v4 }
   0xe   :  { %2746 = vmatprep.subr.bf16.mxu1 %v2981_v0  ;;  %2754 = vmatpush3.bf16.msra.mxu0 %v3072_v12 }
   0xf   :  { %2761 = vmatprep.subr.bf16.mxu0 %v2981_v0  ;;  %2520 = vmatprep.mubr.msk.f32.mxu0 %vm49_vm0, %v36_v58 }
  0x10   :  { %2521 = vmatmul.mubr.msk.f32.gmra.mrb[4].mxu0 %vm49_vm0, %v37_v59 }
  0x11   :  { %2748 = vmatpush3.bf16.msra.mxu1 %v3072_v12  ;;  %2523 = vmatprep.mubr.msk.f32.mxu0 %vm49_vm0, %v38_v60 }
  0x12   :  { %2755 = vmatprep.subr.bf16.mxu1 %v2981_v0 }
  0x14   :  { %2524 = vmatmul.mubr.msk.f32.gmra.mrb[6].mxu0 %vm49_vm0, %v39_v61 }
  0x15   :  { %2556 = vmatprep.mubr.msk.f32.mxu0 %vm2982_vm1, %v2983_v4 }
  0xdb   :  { %v2516_v15 = vpop.f32.mrb[0].mxu0 }
  0xdc   :  { %v140_v16 = vpop.f32.mrb[1].mxu0  ;;  %v146_v40 = vadd.f32 %v2516_v15, %v3093_v14 }
  0xdd   :  { %v141_v17 = vadd.f32 %v3093_v14, %v140_v16 }
  0xdf   :  { %v265_v18 = vpop.f32.mrb[0].mxu1  ;;  %v2519_v3 = vpop.f32.mrb[2].mxu0 }
  0xe0   :  { %v269_v19 = vadd.f32 %v265_v18, %v141_v17  ;;  %v2536_v20 = vpop.f32.mrb[1].mxu1  ;;  %v150_v5 = vpop.f32.mrb[3].mxu0 }
  0xe1   :  { %v151_v15 = vadd.f32 %v3093_v14, %v150_v5 }
  0xe2   :  { %2853 = vtanh.f32 %v269_v19  ;;  %v2361_v23 = vmul.f32 -1.442695, %v269_v19 }
  0xe3   :  { %v3147_v6 = vpop.f32.mrb[4].mxu0 }
  0xe4   :  { %2855 = vpow2.f32 %v2361_v23  ;;  %v3149_v7 = vpop.f32.mrb[5].mxu0 }
  0xe5   :  { %v161_v59 = vadd.f32 %v3093_v14, %v3149_v7 }
  0xe7   :  { %v3160_v11 = vpop.f32.mrb[6].mxu0 }
  0xe8   :  { %v3162_v13 = vpop.f32.mrb[7].mxu0 }
  0xec   :  { %v2854_v21 = vpop.eup %2853 }
  0xed   :  { %284 = vrot.lane.b32.xlu0 %v2854_v21, %s2984_s25 }
  0xee   :  { %v2856_v24 = vpop.eup %2855 }
  0xef   :  { %v273_v25 = vadd.f32 1.0, %v2856_v24 }
  0xf1   :  { %279 = vrot.lane.b32.xlu0 %v277_v22, %s2985_s26  ;;  %2857 = vrcp.f32 %v273_v25 }
  0xfb   :  { %v2858_v26 = vpop.eup %2857 }
 0x15f   :  { %v285_v27 = vpop.permute.xlu0 %284 }
 0x160   :  { %v287_v28 = vmul.f32 %v2858_v26, %v285_v27 }
 0x162   :  { %289 = vrot.lane.b32.xlu1 %v287_v28, %s2985_s26 }
 0x163   :  { %v280_v29 = vpop.permute.xlu0 %279 }
 0x164   :  { %v282_v30 = vmul.f32 %v2858_v26, %v280_v29 }
 0x1d4   :  { %v290_v31 = vpop.permute.xlu1 %289 }
 0x1d5   :  { %v292_v32 = vadd.f32 %v290_v31, %v282_v30 }
 0x1d7   :  { %2859 = vtanh.f32 %v292_v32 }
 0x1e1   :  { %v2860_v33 = vpop.eup %2859 }
 0x1e2   :  { %295 = vrot.lane.b32.xlu1 %v2860_v33, %s2984_s25 }
 0x1e6   :  { %300 = vrot.lane.b32.xlu1 %v292_v32, %s2986_s3 }
 0x254   :  { %v296_v34 = vpop.permute.xlu1 %295 }
 0x255   :  { %v298_v35 = vmul.f32 %v2858_v26, %v296_v34 }
 0x257   :  { %305 = vrot.lane.b32.xlu0 %v298_v35, %s2985_s26 }
 0x258   :  { %v301_v36 = vpop.permute.xlu1 %300 }
 0x259   :  { %303 = vst.msk [vmem:[#allocation5] sm:$0xff] %vm187_vm2, %v301_v36 }
 0x260   :  { %v397_v37 = vld [vmem:[#allocation5] sm:$0xff] }
 0x261   :  { %399 = vrot.lane.b32.xlu1 %v397_v37, %s2985_s26  ;;  %v156_v37 = vadd.f32 %v2519_v3, %v3093_v14 }
 0x2c9   :  { %v306_v38 = vpop.permute.xlu0 %305 }
 0x2ca   :  { %308 = vst.msk [vmem:[#allocation4] sm:$0xff] %vm187_vm2, %v306_v38  ;;  %309 = vst.msk [vmem:[#allocation3] sm:$0xff] %vm187_vm2, %v306_v38 }
 0x2d1   :  { %v311_v39 = vld [vmem:[#allocation4] sm:$0xff] }
 0x2d2   :  { %2546 = vmatmul.mubr.msk.f32.vlgmr.msra.gmra.mrb[2].mxu1 %vm187_vm2, %v311_v39 }
 0x2d3   :  { %2757 = vmatpush3.bf16.msra.mxu1 %v3059_v8  ;;  %2567 = vmatprep.mubr.msk.f32.mxu1 %vm2982_vm1, %v2983_v4  ;;  %v400_v51 = vpop.permute.xlu1 %399 }
 0x2d4   :  { %2758 = vmatprep.subr.bf16.mxu1 %v2981_v0 }
 0x2d7   :  { %2760 = vmatpush3.bf16.msra.mxu1 %v3072_v12 }
 0x2d8   :  { %2767 = vmatprep.subr.bf16.mxu1 %v2981_v0 }
 0x3a5   :  { %v385_v41 = vpop.f32.mrb[2].mxu1 }
 0x3a6   :  { %v389_v42 = vadd.f32 %v385_v41, %v146_v40  ;;  %v2547_v43 = vpop.f32.mrb[3].mxu1 }
 0x3a8   :  { %2861 = vtanh.f32 %v389_v42  ;;  %v2363_v45 = vmul.f32 -1.442695, %v389_v42 }
 0x3aa   :  { %2863 = vpow2.f32 %v2363_v45 }
 0x3b2   :  { %v2862_v44 = vpop.eup %2861 }
 0x3b3   :  { %404 = vrot.lane.b32.xlu0 %v2862_v44, %s2984_s25 }
 0x3b4   :  { %v2864_v46 = vpop.eup %2863 }
 0x3b5   :  { %v393_v47 = vadd.f32 1.0, %v2864_v46 }
 0x3b7   :  { %2865 = vrcp.f32 %v393_v47 }
 0x3c1   :  { %v2866_v48 = vpop.eup %2865 }
 0x3c2   :  { %v402_v52 = vmul.f32 %v2866_v48, %v400_v51 }
 0x425   :  { %v405_v49 = vpop.permute.xlu0 %404 }
 0x426   :  { %v407_v50 = vmul.f32 %v2866_v48, %v405_v49 }
 0x428   :  { %409 = vrot.lane.b32.xlu0 %v407_v50, %s2985_s26 }
 0x49a   :  { %v410_v53 = vpop.permute.xlu0 %409 }
 0x49b   :  { %v412_v54 = vadd.f32 %v410_v53, %v402_v52 }
 0x49d   :  { %2867 = vtanh.f32 %v412_v54 }
 0x4a7   :  { %v2868_v55 = vpop.eup %2867 }
 0x4a8   :  { %415 = vrot.lane.b32.xlu1 %v2868_v55, %s2984_s25 }
 0x4ac   :  { %420 = vrot.lane.b32.xlu1 %v412_v54, %s2986_s3 }
 0x51a   :  { %v416_v62 = vpop.permute.xlu1 %415 }
 0x51b   :  { %v418_v63 = vmul.f32 %v2866_v48, %v416_v62 }
 0x51d   :  { %425 = vrot.lane.b32.xlu0 %v418_v63, %s2985_s26 }
 0x51e   :  { %v421_v1 = vpop.permute.xlu1 %420 }
 0x51f   :  { %423 = vst.msk [vmem:[#allocation5] sm:$0xff] %vm187_vm2, %v421_v1 }
 0x526   :  { %v517_v2 = vld [vmem:[#allocation5] sm:$0xff] }
 0x527   :  { %519 = vrot.lane.b32.xlu1 %v517_v2, %s2985_s26 }
 0x58f   :  { %v426_v9 = vpop.permute.xlu0 %425 }
 0x590   :  { %428 = vst.msk [vmem:[#allocation4] sm:$0xff] %vm187_vm2, %v426_v9  ;;  %429 = vst.msk [vmem:[#allocation3 + $0x8] sm:$0xff] %vm187_vm2, %v426_v9 }
 0x597   :  { %v431_v10 = vld [vmem:[#allocation4] sm:$0xff] }
 0x598   :  { %2557 = vmatmul.mubr.msk.f32.vlgmr.msra.gmra.mrb[8].mxu0 %vm187_vm2, %v431_v10 }
 0x599   :  { %2763 = vmatpush3.bf16.msra.mxu0 %v3059_v8  ;;  %2578 = vmatprep.mubr.msk.f32.mxu0 %vm2982_vm1, %v2983_v4  ;;  %v520_v26 = vpop.permute.xlu1 %519 }
 0x59a   :  { %2764 = vmatprep.subr.bf16.mxu0 %v2981_v0 }
 0x59d   :  { %2766 = vmatpush3.bf16.msra.mxu0 %v3072_v12 }
 0x59e   :  { %2773 = vmatprep.subr.bf16.mxu0 %v2981_v0 }
 0x66b   :  { %v505_v16 = vpop.f32.mrb[8].mxu0 }
 0x66c   :  { %v509_v17 = vadd.f32 %v505_v16, %v151_v15  ;;  %v2558_v18 = vpop.f32.mrb[9].mxu0 }
 0x66e   :  { %2869 = vtanh.f32 %v509_v17  ;;  %v2365_v20 = vmul.f32 -1.442695, %v509_v17 }
 0x670   :  { %2871 = vpow2.f32 %v2365_v20 }
 0x678   :  { %v2870_v19 = vpop.eup %2869 }
 0x679   :  { %524 = vrot.lane.b32.xlu0 %v2870_v19, %s2984_s25 }
 0x67a   :  { %v2872_v21 = vpop.eup %2871 }
 0x67b   :  { %v513_v22 = vadd.f32 1.0, %v2872_v21 }
 0x67d   :  { %2873 = vrcp.f32 %v513_v22 }
 0x687   :  { %v2874_v23 = vpop.eup %2873 }
 0x688   :  { %v522_v27 = vmul.f32 %v2874_v23, %v520_v26 }
 0x6eb   :  { %v525_v24 = vpop.permute.xlu0 %524 }
 0x6ec   :  { %v527_v25 = vmul.f32 %v2874_v23, %v525_v24 }
 0x6ee   :  { %529 = vrot.lane.b32.xlu0 %v527_v25, %s2985_s26  ;;  %v166_v25 = vadd.f32 %v3147_v6, %v3093_v14 }
 0x760   :  { %v530_v28 = vpop.permute.xlu0 %529 }
 0x761   :  { %v532_v29 = vadd.f32 %v530_v28, %v522_v27 }
 0x763   :  { %2875 = vtanh.f32 %v532_v29 }
 0x76d   :  { %v2876_v30 = vpop.eup %2875 }
 0x76e   :  { %535 = vrot.lane.b32.xlu1 %v2876_v30, %s2984_s25 }
 0x772   :  { %540 = vrot.lane.b32.xlu1 %v532_v29, %s2986_s3 }
 0x7e0   :  { %v536_v31 = vpop.permute.xlu1 %535 }
 0x7e1   :  { %v538_v32 = vmul.f32 %v2874_v23, %v536_v31 }
 0x7e3   :  { %545 = vrot.lane.b32.xlu0 %v538_v32, %s2985_s26 }
 0x7e4   :  { %v541_v33 = vpop.permute.xlu1 %540 }
 0x7e5   :  { %543 = vst.msk [vmem:[#allocation5] sm:$0xff] %vm187_vm2, %v541_v33 }
 0x7ec   :  { %v637_v34 = vld [vmem:[#allocation5] sm:$0xff] }
 0x7ed   :  { %639 = vrot.lane.b32.xlu1 %v637_v34, %s2985_s26 }
 0x855   :  { %v546_v35 = vpop.permute.xlu0 %545 }
 0x856   :  { %548 = vst.msk [vmem:[#allocation4] sm:$0xff] %vm187_vm2, %v546_v35  ;;  %549 = vst.msk [vmem:[#allocation3 + $0x10] sm:$0xff] %vm187_vm2, %v546_v35 }
 0x85d   :  { %v551_v36 = vld [vmem:[#allocation4] sm:$0xff] }
 0x85e   :  { %2568 = vmatmul.mubr.msk.f32.vlgmr.msra.gmra.mrb[4].mxu1 %vm187_vm2, %v551_v36 }
 0x85f   :  { %2769 = vmatpush3.bf16.msra.mxu1 %v3059_v8  ;;  %2589 = vmatprep.mubr.msk.f32.mxu1 %vm2982_vm1, %v2983_v4  ;;  %v640_v48 = vpop.permute.xlu1 %639 }
 0x860   :  { %2770 = vmatprep.subr.bf16.mxu1 %v2981_v0 }
 0x863   :  { %2772 = vmatpush3.bf16.msra.mxu1 %v3072_v12 }
 0x864   :  { %2779 = vmatprep.subr.bf16.mxu1 %v2981_v0 }
 0x931   :  { %v625_v38 = vpop.f32.mrb[4].mxu1 }
 0x932   :  { %v629_v39 = vadd.f32 %v625_v38, %v156_v37  ;;  %v2569_v40 = vpop.f32.mrb[5].mxu1  ;;  %v1158_v38 = vld [vmem:[%s3472_s4] sm:$0xff] }
 0x934   :  { %2877 = vtanh.f32 %v629_v39  ;;  %v2367_v42 = vmul.f32 -1.442695, %v629_v39  ;;  %v1159_v39 = vld [vmem:[%s3472_s4 + $0x8] sm:$0xff] }
 0x935   :  { %v2785_v40 = vpack.c.bf16 %v1159_v39, %v1158_v38  ;;  %v1310_v39 = vld [vmem:[%s3473_s5] sm:$0xff] }
 0x936   :  { %2879 = vpow2.f32 %v2367_v42 }
 0x93e   :  { %v2878_v41 = vpop.eup %2877 }
 0x93f   :  { %644 = vrot.lane.b32.xlu0 %v2878_v41, %s2984_s25 }
 0x940   :  { %v2880_v43 = vpop.eup %2879 }
 0x941   :  { %v633_v44 = vadd.f32 1.0, %v2880_v43 }
 0x943   :  { %2881 = vrcp.f32 %v633_v44 }
 0x94d   :  { %v2882_v45 = vpop.eup %2881 }
 0x94e   :  { %v642_v49 = vmul.f32 %v2882_v45, %v640_v48 }
 0x9b1   :  { %v645_v46 = vpop.permute.xlu0 %644 }
 0x9b2   :  { %v647_v47 = vmul.f32 %v2882_v45, %v645_v46  ;;  %v1160_v46 = vld [vmem:[%s3472_s4 + $0x10] sm:$0xff] }
 0x9b4   :  { %649 = vrot.lane.b32.xlu0 %v647_v47, %s2985_s26  ;;  %v1161_v47 = vld [vmem:[%s3472_s4 + $0x18] sm:$0xff] }
 0x9b5   :  { %v2789_v48 = vpack.c.bf16 %v1161_v47, %v1160_v46 }
 0xa26   :  { %v650_v50 = vpop.permute.xlu0 %649 }
 0xa27   :  { %v652_v51 = vadd.f32 %v650_v50, %v642_v49  ;;  %v1150_v50 = vld [vmem:[#allocation3] sm:$0xff] }
 0xa29   :  { %2883 = vtanh.f32 %v652_v51 }
 0xa33   :  { %v2884_v52 = vpop.eup %2883 }
 0xa34   :  { %655 = vrot.lane.b32.xlu1 %v2884_v52, %s2984_s25  ;;  %v1152_v52 = vld [vmem:[#allocation3 + $0x10] sm:$0xff] }
 0xa38   :  { %660 = vrot.lane.b32.xlu1 %v652_v51, %s2986_s3  ;;  %v1151_v51 = vld [vmem:[#allocation3 + $0x8] sm:$0xff] }
 0xaa6   :  { %v656_v53 = vpop.permute.xlu1 %655 }
 0xaa7   :  { %v658_v54 = vmul.f32 %v2882_v45, %v656_v53 }
 0xaa9   :  { %665 = vrot.lane.b32.xlu0 %v658_v54, %s2985_s26 }
 0xaaa   :  { %v661_v55 = vpop.permute.xlu1 %660 }
 0xaab   :  { %663 = vst.msk [vmem:[#allocation5] sm:$0xff] %vm187_vm2, %v661_v55 }
 0xab2   :  { %v757_v56 = vld [vmem:[#allocation5] sm:$0xff] }
 0xab3   :  { %759 = vrot.lane.b32.xlu1 %v757_v56, %s2985_s26  ;;  %v171_v56 = vadd.f32 %v3093_v14, %v3162_v13 }
 0xb1b   :  { %v666_v57 = vpop.permute.xlu0 %665 }
 0xb1c   :  { %668 = vst.msk [vmem:[#allocation4] sm:$0xff] %vm187_vm2, %v666_v57  ;;  %669 = vst.msk [vmem:[#allocation3 + $0x18] sm:$0xff] %vm187_vm2, %v666_v57 }
 0xb23   :  { %v671_v58 = vld [vmem:[#allocation4] sm:$0xff]  ;;  %v1153_v53 = vld [vmem:[#allocation3 + $0x18] sm:$0xff] }
 0xb24   :  { %2579 = vmatmul.mubr.msk.f32.vlgmr.msra.gmra.mrb[10].mxu0 %vm187_vm2, %v671_v58 }
 0xb25   :  { %2775 = vmatpush3.bf16.msra.mxu0 %v3059_v8  ;;  %2600 = vmatprep.mubr.msk.f32.mxu0 %vm2982_vm1, %v2983_v4  ;;  %v760_v15 = vpop.permute.xlu1 %759 }
 0xb26   :  { %2776 = vmatprep.subr.bf16.mxu0 %v2981_v0 }
 0xb29   :  { %2778 = vmatpush3.bf16.msra.mxu0 %v3072_v12 }
 0xb2a   :  { %2786 = vmatprep.subr.bf16.mxu0 %v2785_v40 }
 0xbf7   :  { %v745_v60 = vpop.f32.mrb[10].mxu0 }
 0xbf8   :  { %v749_v61 = vadd.f32 %v745_v60, %v161_v59  ;;  %v2580_v62 = vpop.f32.mrb[11].mxu0 }
 0xbfa   :  { %2885 = vtanh.f32 %v749_v61  ;;  %v2369_v1 = vmul.f32 -1.442695, %v749_v61 }
 0xbfc   :  { %2887 = vpow2.f32 %v2369_v1 }
 0xc04   :  { %v2886_v63 = vpop.eup %2885 }
 0xc05   :  { %764 = vrot.lane.b32.xlu0 %v2886_v63, %s2984_s25 }
 0xc06   :  { %v2888_v2 = vpop.eup %2887 }
 0xc07   :  { %v753_v3 = vadd.f32 1.0, %v2888_v2 }
 0xc09   :  { %2889 = vrcp.f32 %v753_v3 }
 0xc13   :  { %v2890_v5 = vpop.eup %2889 }
 0xc14   :  { %v762_v16 = vmul.f32 %v2890_v5, %v760_v15 }
 0xc77   :  { %v765_v9 = vpop.permute.xlu0 %764 }
 0xc78   :  { %v767_v10 = vmul.f32 %v2890_v5, %v765_v9 }
 0xc7a   :  { %769 = vrot.lane.b32.xlu0 %v767_v10, %s2985_s26 }
 0xcec   :  { %v770_v7 = vpop.permute.xlu0 %769 }
 0xced   :  { %v772_v17 = vadd.f32 %v770_v7, %v762_v16 }
 0xcef   :  { %2891 = vtanh.f32 %v772_v17 }
 0xcf9   :  { %v2892_v18 = vpop.eup %2891 }
 0xcfa   :  { %775 = vrot.lane.b32.xlu1 %v2892_v18, %s2984_s25 }
 0xcfe   :  { %780 = vrot.lane.b32.xlu1 %v772_v17, %s2986_s3 }
 0xd6c   :  { %v776_v19 = vpop.permute.xlu1 %775 }
 0xd6d   :  { %v778_v20 = vmul.f32 %v2890_v5, %v776_v19 }
 0xd6f   :  { %785 = vrot.lane.b32.xlu0 %v778_v20, %s2985_s26 }
 0xd70   :  { %v781_v21 = vpop.permute.xlu1 %780 }
 0xd71   :  { %783 = vst.msk [vmem:[#allocation5] sm:$0xff] %vm187_vm2, %v781_v21 }
 0xd78   :  { %v877_v22 = vld [vmem:[#allocation5] sm:$0xff] }
 0xd79   :  { %879 = vrot.lane.b32.xlu1 %v877_v22, %s2985_s26 }
 0xde1   :  { %v786_v23 = vpop.permute.xlu0 %785 }
 0xde2   :  { %788 = vst.msk [vmem:[#allocation4] sm:$0xff] %vm187_vm2, %v786_v23  ;;  %789 = vst.msk [vmem:[#allocation3 + $0x20] sm:$0xff] %vm187_vm2, %v786_v23 }
 0xde9   :  { %v791_v24 = vld [vmem:[#allocation4] sm:$0xff] }
 0xdea   :  { %2590 = vmatmul.mubr.msk.f32.vlgmr.msra.gmra.mrb[6].mxu1 %vm187_vm2, %v791_v24  ;;  %v1154_v54 = vld [vmem:[#allocation3 + $0x20] sm:$0xff] }
 0xdeb   :  { %2781 = vmatpush3.bf16.msra.mxu1 %v3059_v8  ;;  %2611 = vmatprep.mubr.msk.f32.mxu1 %vm2982_vm1, %v2983_v4  ;;  %v880_v34 = vpop.permute.xlu1 %879 }
 0xdec   :  { %2782 = vmatprep.subr.bf16.mxu1 %v2981_v0 }
 0xdef   :  { %2784 = vmatpush3.bf16.msra.mxu1 %v3072_v12 }
 0xdf0   :  { %2793 = vmatprep.subr.bf16.mxu1 %v2981_v0 }
 0xebd   :  { %v865_v26 = vpop.f32.mrb[6].mxu1 }
 0xebe   :  { %v869_v27 = vadd.f32 %v865_v26, %v166_v25  ;;  %v2591_v28 = vpop.f32.mrb[7].mxu1 }
 0xebf   :  { %v176_v28 = vadd.f32 %v3160_v11, %v3093_v14 }
 0xec0   :  { %2893 = vtanh.f32 %v869_v27  ;;  %v2371_v8 = vmul.f32 -1.442695, %v869_v27 }
 0xec2   :  { %2895 = vpow2.f32 %v2371_v8 }
 0xeca   :  { %v2894_v29 = vpop.eup %2893 }
 0xecb   :  { %884 = vrot.lane.b32.xlu0 %v2894_v29, %s2984_s25 }
 0xecc   :  { %v2896_v30 = vpop.eup %2895 }
 0xecd   :  { %v873_v31 = vadd.f32 1.0, %v2896_v30 }
 0xecf   :  { %2897 = vrcp.f32 %v873_v31 }
 0xed9   :  { %v2898_v32 = vpop.eup %2897 }
 0xeda   :  { %v882_v35 = vmul.f32 %v2898_v32, %v880_v34 }
 0xf3d   :  { %v885_v33 = vpop.permute.xlu0 %884 }
 0xf3e   :  { %v887_v12 = vmul.f32 %v2898_v32, %v885_v33 }
 0xf40   :  { %889 = vrot.lane.b32.xlu0 %v887_v12, %s2985_s26 }
 0xfb2   :  { %v890_v6 = vpop.permute.xlu0 %889 }
 0xfb3   :  { %v892_v36 = vadd.f32 %v890_v6, %v882_v35 }
 0xfb5   :  { %2899 = vtanh.f32 %v892_v36 }
 0xfbf   :  { %v2900_v37 = vpop.eup %2899 }
 0xfc0   :  { %895 = vrot.lane.b32.xlu1 %v2900_v37, %s2984_s25 }
 0xfc4   :  { %900 = vrot.lane.b32.xlu1 %v892_v36, %s2986_s3 }
0x1032   :  { %v896_v41 = vpop.permute.xlu1 %895 }
0x1033   :  { %v898_v42 = vmul.f32 %v2898_v32, %v896_v41 }
0x1035   :  { %905 = vrot.lane.b32.xlu0 %v898_v42, %s2985_s26  ;;  %v1312_v42 = vld [vmem:[%s3473_s5 + $0x10] sm:$0xff] }
0x1036   :  { %v901_v43 = vpop.permute.xlu1 %900 }
0x1037   :  { %903 = vst.msk [vmem:[#allocation5] sm:$0xff] %vm187_vm2, %v901_v43  ;;  %v1313_v43 = vld [vmem:[%s3473_s5 + $0x18] sm:$0xff] }
0x103e   :  { %v997_v44 = vld [vmem:[#allocation5] sm:$0xff] }
0x103f   :  { %999 = vrot.lane.b32.xlu1 %v997_v44, %s2985_s26  ;;  %v3294_v44 = vpack.c.bf16 %v1313_v43, %v1312_v42 }
0x10a7   :  { %v906_v45 = vpop.permute.xlu0 %905 }
0x10a8   :  { %908 = vst.msk [vmem:[#allocation4] sm:$0xff] %vm187_vm2, %v906_v45  ;;  %909 = vst.msk [vmem:[#allocation3 + $0x28] sm:$0xff] %vm187_vm2, %v906_v45 }
0x10af   :  { %v911_v49 = vld [vmem:[#allocation4] sm:$0xff]  ;;  %v1155_v55 = vld [vmem:[#allocation3 + $0x28] sm:$0xff] }
0x10b0   :  { %2601 = vmatmul.mubr.msk.f32.vlgmr.msra.gmra.mrb[12].mxu0 %vm187_vm2, %v911_v49 }
0x10b1   :  { %2788 = vmatpush3.bf16.msra.mxu0 %v2785_v40  ;;  %2622 = vmatprep.mubr.msk.f32.mxu0 %vm187_vm2, %v1150_v50  ;;  %v1000_v7 = vpop.permute.xlu1 %999  ;;  %v1311_v40 = vld [vmem:[%s3473_s5 + $0x8] sm:$0xff] }
0x10b2   :  { %2790 = vmatprep.subr.bf16.mxu0 %v2789_v48  ;;  %v3285_v41 = vpack.c.bf16 %v1311_v40, %v1310_v39 }
0x10b5   :  { %2792 = vmatpush3.bf16.msra.mxu0 %v2789_v48 }
0x10b6   :  { %2805 = vmatprep.subr.bf16.mxu0 %v2981_v0 }
0x10b8   :  { %2623 = vmatmul.mubr.msk.f32.vlgmr.msra.gmra.mrb[14].mxu0 %vm187_vm2, %v1151_v51 }
0x10b9   :  { %2625 = vmatprep.mubr.msk.f32.mxu0 %vm187_vm2, %v1152_v52  ;;  %2807 = vmatpush3.bf16.msra.mxu0 %v3285_v41  ;;  %v3325_v52 = vld [vmem:[%s3474_s6] ss:$0 sm:$0xff] }
0x10ba   :  { %2808 = vmatprep.subr.bf16.mxu0 %v2981_v0 }
0x10bc   :  { %2626 = vmatmul.mubr.msk.f32.gmra.mrb[16].mxu0 %vm187_vm2, %v1153_v53 }
0x10bd   :  { %2628 = vmatprep.mubr.msk.f32.mxu0 %vm187_vm2, %v1154_v54  ;;  %2810 = vmatpush3.bf16.msra.mxu0 %v3294_v44 }
0x10be   :  { %2817 = vmatprep.subr.bf16.mxu0 %v2981_v0 }
0x10c0   :  { %2629 = vmatmul.mubr.msk.f32.gmra.mrb[18].mxu0 %vm187_vm2, %v1155_v55 }
0x1183   :  { %v985_v57 = vpop.f32.mrb[12].mxu0 }
0x1184   :  { %v989_v58 = vadd.f32 %v985_v57, %v171_v56  ;;  %v2602_v59 = vpop.f32.mrb[13].mxu0 }
0x1186   :  { %2901 = vtanh.f32 %v989_v58  ;;  %v2373_v13 = vmul.f32 -1.442695, %v989_v58 }
0x1188   :  { %2903 = vpow2.f32 %v2373_v13 }
0x118b   :  { %v3248_v60 = vpop.f32.mrb[14].mxu0 }
0x118c   :  { %v3250_v61 = vpop.f32.mrb[15].mxu0 }
0x118d   :  { %v1260_v53 = vadd.f32 %v3325_v52, %v3250_v61 }
0x118f   :  { %v3252_v62 = vpop.f32.mrb[16].mxu0 }
0x1190   :  { %v2902_v63 = vpop.eup %2901  ;;  %v3254_v1 = vpop.f32.mrb[17].mxu0 }
0x1191   :  { %1004 = vrot.lane.b32.xlu0 %v2902_v63, %s2984_s25  ;;  %v1270_v42 = vadd.f32 %v3325_v52, %v3254_v1 }
0x1192   :  { %v2904_v5 = vpop.eup %2903 }
0x1193   :  { %v3257_v2 = vpop.f32.mrb[18].mxu0  ;;  %v993_v9 = vadd.f32 1.0, %v2904_v5 }
0x1194   :  { %v3259_v3 = vpop.f32.mrb[19].mxu0 }
0x1195   :  { %2905 = vrcp.f32 %v993_v9 }
0x119f   :  { %v2906_v10 = vpop.eup %2905 }
0x11a0   :  { %v1002_v17 = vmul.f32 %v2906_v10, %v1000_v7 }
0x1203   :  { %v1005_v15 = vpop.permute.xlu0 %1004 }
0x1204   :  { %v1007_v16 = vmul.f32 %v2906_v10, %v1005_v15 }
0x1206   :  { %1009 = vrot.lane.b32.xlu0 %v1007_v16, %s2985_s26 }
0x1278   :  { %v1010_v18 = vpop.permute.xlu0 %1009 }
0x1279   :  { %v1012_v19 = vadd.f32 %v1010_v18, %v1002_v17 }
0x127b   :  { %2907 = vtanh.f32 %v1012_v19 }
0x1285   :  { %v2908_v20 = vpop.eup %2907 }
0x1286   :  { %1015 = vrot.lane.b32.xlu1 %v2908_v20, %s2984_s25 }
0x128a   :  { %1020 = vrot.lane.b32.xlu1 %v1012_v19, %s2986_s3 }
0x12f8   :  { %v1016_v21 = vpop.permute.xlu1 %1015 }
0x12f9   :  { %v1018_v22 = vmul.f32 %v2906_v10, %v1016_v21 }
0x12fb   :  { %1025 = vrot.lane.b32.xlu0 %v1018_v22, %s2985_s26 }
0x12fc   :  { %v1021_v23 = vpop.permute.xlu1 %1020 }
0x12fd   :  { %1023 = vst.msk [vmem:[#allocation5] sm:$0xff] %vm187_vm2, %v1021_v23 }
0x1304   :  { %v1117_v24 = vld [vmem:[#allocation5] sm:$0xff] }
0x1305   :  { %1119 = vrot.lane.b32.xlu1 %v1117_v24, %s2985_s26 }
0x136d   :  { %v1026_v25 = vpop.permute.xlu0 %1025 }
0x136e   :  { %1028 = vst.msk [vmem:[#allocation4] sm:$0xff] %vm187_vm2, %v1026_v25  ;;  %1029 = vst.msk [vmem:[#allocation3 + $0x30] sm:$0xff] %vm187_vm2, %v1026_v25  ;;  %v1265_v25 = vadd.f32 %v3248_v60, %v3325_v52 }
0x1375   :  { %v1031_v26 = vld [vmem:[#allocation4] sm:$0xff]  ;;  %v1156_v27 = vld [vmem:[#allocation3 + $0x30] sm:$0xff] }
0x1376   :  { %2612 = vmatmul.mubr.msk.f32.vlgmr.msra.gmra.mrb[8].mxu1 %vm187_vm2, %v1031_v26  ;;  %2631 = vmatprep.mubr.msk.f32.mxu0 %vm187_vm2, %v1156_v27 }
0x1377   :  { %2642 = vmatprep.mubr.msk.f32.mxu1 %vm2982_vm1, %v2983_v4  ;;  %v1120_v36 = vpop.permute.xlu1 %1119  ;;  %2795 = vmatpush3.bf16.msra.mxu1 %v3285_v41 }
0x1378   :  { %2796 = vmatprep.subr.bf16.mxu1 %v2981_v0 }
0x137b   :  { %2798 = vmatpush3.bf16.msra.mxu1 %v3294_v44 }
0x137c   :  { %2799 = vmatprep.subr.bf16.mxu1 %v2981_v0 }
0x1449   :  { %v1105_v29 = vpop.f32.mrb[8].mxu1 }
0x144a   :  { %v1109_v8 = vadd.f32 %v1105_v29, %v176_v28  ;;  %v2613_v30 = vpop.f32.mrb[9].mxu1 }
0x144c   :  { %2909 = vtanh.f32 %v1109_v8  ;;  %v2375_v32 = vmul.f32 -1.442695, %v1109_v8 }
0x144e   :  { %2911 = vpow2.f32 %v2375_v32 }
0x1456   :  { %v2910_v31 = vpop.eup %2909 }
0x1457   :  { %1124 = vrot.lane.b32.xlu0 %v2910_v31, %s2984_s25 }
0x1458   :  { %v2912_v33 = vpop.eup %2911 }
0x1459   :  { %v1113_v12 = vadd.f32 1.0, %v2912_v33 }
0x145b   :  { %2913 = vrcp.f32 %v1113_v12 }
0x1465   :  { %v2914_v34 = vpop.eup %2913 }
0x1466   :  { %v1122_v37 = vmul.f32 %v2914_v34, %v1120_v36 }
0x14c9   :  { %v1125_v35 = vpop.permute.xlu0 %1124 }
0x14ca   :  { %v1127_v6 = vmul.f32 %v2914_v34, %v1125_v35 }
0x14cc   :  { %1129 = vrot.lane.b32.xlu0 %v1127_v6, %s2985_s26 }
0x153e   :  { %v1130_v14 = vpop.permute.xlu0 %1129 }
0x153f   :  { %v1132_v11 = vadd.f32 %v1130_v14, %v1122_v37 }
0x1541   :  { %2915 = vtanh.f32 %v1132_v11 }
0x154b   :  { %v2916_v38 = vpop.eup %2915 }
0x154c   :  { %1135 = vrot.lane.b32.xlu1 %v2916_v38, %s2984_s25 }
0x1550   :  { %1140 = vrot.lane.b32.xlu1 %v1132_v11, %s2986_s3 }
0x15be   :  { %v1136_v45 = vpop.permute.xlu1 %1135 }
0x15bf   :  { %v1138_v46 = vmul.f32 %v2914_v34, %v1136_v45 }
0x15c1   :  { %1145 = vrot.lane.b32.xlu0 %v1138_v46, %s2985_s26 }
0x15c2   :  { %v1141_v47 = vpop.permute.xlu1 %1140 }
0x15c3   :  { %1143 = vst.msk [vmem:[#allocation5] sm:$0xff] %vm187_vm2, %v1141_v47 }
0x15c4   :  { %1307 = vst.msk [vmem:[#allocation5] sm:$0xff] %vm187_vm2, %v2983_v4 }
0x15cb   :  { %v1395_v48 = vld [vmem:[#allocation5] sm:$0xff] }
0x15cc   :  { %1397 = vrot.lane.b32.xlu1 %v1395_v48, %s2985_s26 }
0x1633   :  { %v1146_v49 = vpop.permute.xlu0 %1145 }
0x1634   :  { %1148 = vst.msk [vmem:[#allocation4] sm:$0xff] %vm187_vm2, %v1146_v49  ;;  %1149 = vst.msk [vmem:[#allocation3 + $0x38] sm:$0xff] %vm187_vm2, %v1146_v49 }
0x1635   :  { %1306 = vst.msk [vmem:[#allocation4] sm:$0xff] %vm187_vm2, %v2983_v4 }
0x163b   :  { %v1157_v50 = vld [vmem:[#allocation3 + $0x38] sm:$0xff] }
0x163c   :  { %2632 = vmatmul.mubr.msk.f32.gmra.mrb[20].mxu0 %vm187_vm2, %v1157_v50  ;;  %v1309_v51 = vld [vmem:[#allocation4] sm:$0xff] }
0x163d   :  { %2643 = vmatmul.mubr.msk.f32.vlgmr.msra.gmra.mrb[10].mxu1 %vm187_vm2, %v1309_v51  ;;  %2664 = vmatprep.mubr.msk.f32.mxu0 %vm2982_vm1, %v2983_v4 }
0x163e   :  { %2801 = vmatpush3.bf16.msra.mxu1 %v3285_v41  ;;  %2653 = vmatprep.mubr.msk.f32.mxu1 %vm2982_vm1, %v2983_v4  ;;  %v1398_v61 = vpop.permute.xlu1 %1397 }
0x163f   :  { %2802 = vmatprep.subr.bf16.mxu1 %v2981_v0 }
0x1642   :  { %2804 = vmatpush3.bf16.msra.mxu1 %v3294_v44 }
0x1643   :  { %2811 = vmatprep.subr.bf16.mxu1 %v2981_v0 }
0x170f   :  { %v3329_v54 = vpop.f32.mrb[20].mxu0 }
0x1710   :  { %v3331_v55 = vpop.f32.mrb[21].mxu0  ;;  %v1383_v56 = vpop.f32.mrb[10].mxu1 }
0x1711   :  { %v1387_v57 = vadd.f32 %v1383_v56, %v1260_v53  ;;  %v2644_v58 = vpop.f32.mrb[11].mxu1 }
0x1713   :  { %2917 = vtanh.f32 %v1387_v57  ;;  %v2386_v63 = vmul.f32 -1.442695, %v1387_v57 }
0x1715   :  { %2919 = vpow2.f32 %v2386_v63 }
0x171d   :  { %v2918_v59 = vpop.eup %2917 }
0x171e   :  { %1402 = vrot.lane.b32.xlu0 %v2918_v59, %s2984_s25 }
0x171f   :  { %v2920_v13 = vpop.eup %2919 }
0x1720   :  { %v1391_v5 = vadd.f32 1.0, %v2920_v13 }
0x1722   :  { %2921 = vrcp.f32 %v1391_v5 }
0x172c   :  { %v2922_v9 = vpop.eup %2921 }
0x172d   :  { %v1400_v16 = vmul.f32 %v2922_v9, %v1398_v61 }
0x1790   :  { %v1403_v10 = vpop.permute.xlu0 %1402 }
0x1791   :  { %v1405_v15 = vmul.f32 %v2922_v9, %v1403_v10 }
0x1793   :  { %1407 = vrot.lane.b32.xlu0 %v1405_v15, %s2985_s26 }
0x1805   :  { %v1408_v7 = vpop.permute.xlu0 %1407 }
0x1806   :  { %v1410_v17 = vadd.f32 %v1408_v7, %v1400_v16  ;;  %v1275_v16 = vadd.f32 %v3252_v62, %v3325_v52 }
0x1808   :  { %2923 = vtanh.f32 %v1410_v17 }
0x1812   :  { %v2924_v18 = vpop.eup %2923 }
0x1813   :  { %1413 = vrot.lane.b32.xlu1 %v2924_v18, %s2984_s25 }
0x1817   :  { %1418 = vrot.lane.b32.xlu1 %v1410_v17, %s2986_s3 }
0x1885   :  { %v1414_v19 = vpop.permute.xlu1 %1413 }
0x1886   :  { %v1416_v20 = vmul.f32 %v2922_v9, %v1414_v19 }
0x1888   :  { %1423 = vrot.lane.b32.xlu0 %v1416_v20, %s2985_s26 }
0x1889   :  { %v1419_v21 = vpop.permute.xlu1 %1418 }
0x188a   :  { %1421 = vst.msk [vmem:[#allocation5] sm:$0xff] %vm187_vm2, %v1419_v21 }
0x1891   :  { %v1514_v22 = vld [vmem:[#allocation5] sm:$0xff] }
0x1892   :  { %1516 = vrot.lane.b32.xlu1 %v1514_v22, %s2985_s26 }
0x18fa   :  { %v1424_v23 = vpop.permute.xlu0 %1423 }
0x18fb   :  { %1426 = vst.msk [vmem:[#allocation4] sm:$0xff] %vm187_vm2, %v1424_v23 }
0x1902   :  { %v1428_v24 = vld [vmem:[#allocation4] sm:$0xff] }
0x1903   :  { %2654 = vmatmul.mubr.msk.f32.vlgmr.msra.gmra.mrb[12].mxu1 %vm187_vm2, %v1428_v24 }
0x1904   :  { %2813 = vmatpush3.bf16.msra.mxu1 %v3285_v41  ;;  %2675 = vmatprep.mubr.msk.f32.mxu1 %vm2982_vm1, %v2983_v4  ;;  %v1517_v34 = vpop.permute.xlu1 %1516 }
0x1905   :  { %2814 = vmatprep.subr.bf16.mxu1 %v2981_v0 }
0x1908   :  { %2816 = vmatpush3.bf16.msra.mxu1 %v3294_v44 }
0x1909   :  { %2823 = vmatprep.subr.bf16.mxu1 %v2981_v0 }
0x19d6   :  { %v1502_v26 = vpop.f32.mrb[12].mxu1 }
0x19d7   :  { %v1506_v27 = vadd.f32 %v1502_v26, %v1265_v25  ;;  %v2655_v28 = vpop.f32.mrb[13].mxu1 }
0x19d9   :  { %2925 = vtanh.f32 %v1506_v27  ;;  %v2388_v8 = vmul.f32 -1.442695, %v1506_v27 }
0x19db   :  { %2927 = vpow2.f32 %v2388_v8 }
0x19e3   :  { %v2926_v29 = vpop.eup %2925 }
0x19e4   :  { %1521 = vrot.lane.b32.xlu0 %v2926_v29, %s2984_s25 }
0x19e5   :  { %v2928_v30 = vpop.eup %2927 }
0x19e6   :  { %v1510_v31 = vadd.f32 1.0, %v2928_v30 }
0x19e8   :  { %2929 = vrcp.f32 %v1510_v31 }
0x19f2   :  { %v2930_v32 = vpop.eup %2929 }
0x19f3   :  { %v1519_v35 = vmul.f32 %v2930_v32, %v1517_v34  ;;  %v1280_v34 = vadd.f32 %v3325_v52, %v3259_v3 }
0x1a56   :  { %v1522_v33 = vpop.permute.xlu0 %1521 }
0x1a57   :  { %v1524_v12 = vmul.f32 %v2930_v32, %v1522_v33 }
0x1a59   :  { %1526 = vrot.lane.b32.xlu0 %v1524_v12, %s2985_s26 }
0x1acb   :  { %v1527_v60 = vpop.permute.xlu0 %1526 }
0x1acc   :  { %v1529_v6 = vadd.f32 %v1527_v60, %v1519_v35 }
0x1ace   :  { %2931 = vtanh.f32 %v1529_v6 }
0x1ad8   :  { %v2932_v36 = vpop.eup %2931 }
0x1ad9   :  { %1532 = vrot.lane.b32.xlu1 %v2932_v36, %s2984_s25 }
0x1add   :  { %1537 = vrot.lane.b32.xlu1 %v1529_v6, %s2986_s3 }
0x1b4b   :  { %v1533_v37 = vpop.permute.xlu1 %1532 }
0x1b4c   :  { %v1535_v14 = vmul.f32 %v2930_v32, %v1533_v37 }
0x1b4e   :  { %1542 = vrot.lane.b32.xlu0 %v1535_v14, %s2985_s26 }
0x1b4f   :  { %v1538_v11 = vpop.permute.xlu1 %1537 }
0x1b50   :  { %1540 = vst.msk [vmem:[#allocation5] sm:$0xff] %vm187_vm2, %v1538_v11 }
0x1b57   :  { %v1633_v38 = vld [vmem:[#allocation5] sm:$0xff] }
0x1b58   :  { %1635 = vrot.lane.b32.xlu1 %v1633_v38, %s2985_s26 }
0x1bc0   :  { %v1543_v39 = vpop.permute.xlu0 %1542 }
0x1bc1   :  { %1545 = vst.msk [vmem:[#allocation4] sm:$0xff] %vm187_vm2, %v1543_v39 }
0x1bc8   :  { %v1547_v40 = vld [vmem:[#allocation4] sm:$0xff] }
0x1bc9   :  { %2665 = vmatmul.mubr.msk.f32.vlgmr.msra.gmra.mrb[22].mxu0 %vm187_vm2, %v1547_v40 }
0x1bca   :  { %2819 = vmatpush3.bf16.msra.mxu0 %v3285_v41  ;;  %2686 = vmatprep.mubr.msk.f32.mxu0 %vm2982_vm1, %v2983_v4  ;;  %v1636_v57 = vpop.permute.xlu1 %1635 }
0x1bcb   :  { %2820 = vmatprep.subr.bf16.mxu0 %v2981_v0 }
0x1bce   :  { %2822 = vmatpush3.bf16.msra.mxu0 %v3294_v44 }
0x1bcf   :  { %2829 = vmatprep.subr.bf16.mxu0 %v2981_v0 }
0x1c9c   :  { %v1621_v43 = vpop.f32.mrb[22].mxu0 }
0x1c9d   :  { %v1625_v45 = vadd.f32 %v1621_v43, %v1270_v42  ;;  %v2666_v46 = vpop.f32.mrb[23].mxu0 }
0x1c9f   :  { %2933 = vtanh.f32 %v1625_v45  ;;  %v2390_v48 = vmul.f32 -1.442695, %v1625_v45 }
0x1ca1   :  { %2935 = vpow2.f32 %v2390_v48 }
0x1ca9   :  { %v2934_v47 = vpop.eup %2933 }
0x1caa   :  { %1640 = vrot.lane.b32.xlu0 %v2934_v47, %s2984_s25 }
0x1cab   :  { %v2936_v49 = vpop.eup %2935 }
0x1cac   :  { %v1629_v50 = vadd.f32 1.0, %v2936_v49 }
0x1cae   :  { %2937 = vrcp.f32 %v1629_v50 }
0x1cb8   :  { %v2938_v51 = vpop.eup %2937 }
0x1cb9   :  { %v1638_v58 = vmul.f32 %v2938_v51, %v1636_v57 }
0x1d1c   :  { %v1641_v53 = vpop.permute.xlu0 %1640 }
0x1d1d   :  { %v1643_v56 = vmul.f32 %v2938_v51, %v1641_v53 }
0x1d1f   :  { %1645 = vrot.lane.b32.xlu0 %v1643_v56, %s2985_s26  ;;  %v1285_v56 = vadd.f32 %v3257_v2, %v3325_v52 }
0x1d91   :  { %v1646_v1 = vpop.permute.xlu0 %1645 }
0x1d92   :  { %v1648_v59 = vadd.f32 %v1646_v1, %v1638_v58 }
0x1d94   :  { %2939 = vtanh.f32 %v1648_v59 }
0x1d9e   :  { %v2940_v63 = vpop.eup %2939 }
0x1d9f   :  { %1651 = vrot.lane.b32.xlu1 %v2940_v63, %s2984_s25 }
0x1da3   :  { %1656 = vrot.lane.b32.xlu1 %v1648_v59, %s2986_s3 }
0x1e11   :  { %v1652_v13 = vpop.permute.xlu1 %1651 }
0x1e12   :  { %v1654_v5 = vmul.f32 %v2938_v51, %v1652_v13 }
0x1e14   :  { %1661 = vrot.lane.b32.xlu0 %v1654_v5, %s2985_s26 }
0x1e15   :  { %v1657_v9 = vpop.permute.xlu1 %1656 }
0x1e16   :  { %1659 = vst.msk [vmem:[#allocation5] sm:$0xff] %vm187_vm2, %v1657_v9 }
0x1e1d   :  { %v1752_v10 = vld [vmem:[#allocation5] sm:$0xff] }
0x1e1e   :  { %1754 = vrot.lane.b32.xlu1 %v1752_v10, %s2985_s26 }
0x1e86   :  { %v1662_v15 = vpop.permute.xlu0 %1661 }
0x1e87   :  { %1664 = vst.msk [vmem:[#allocation4] sm:$0xff] %vm187_vm2, %v1662_v15 }
0x1e8e   :  { %v1666_v61 = vld [vmem:[#allocation4] sm:$0xff] }
0x1e8f   :  { %2676 = vmatmul.mubr.msk.f32.vlgmr.msra.gmra.mrb[14].mxu1 %vm187_vm2, %v1666_v61 }
0x1e90   :  { %2825 = vmatpush3.bf16.msra.mxu1 %v3285_v41  ;;  %2697 = vmatprep.mubr.msk.f32.mxu1 %vm2982_vm1, %v2983_v4  ;;  %v1755_v26 = vpop.permute.xlu1 %1754 }
0x1e91   :  { %2826 = vmatprep.subr.bf16.mxu1 %v2981_v0 }
0x1e94   :  { %2828 = vmatpush3.bf16.msra.mxu1 %v3294_v44 }
0x1e95   :  { %2835 = vmatprep.subr.bf16.mxu1 %v2981_v0 }
0x1f62   :  { %v1740_v7 = vpop.f32.mrb[14].mxu1 }
0x1f63   :  { %v1744_v17 = vadd.f32 %v1740_v7, %v1275_v16  ;;  %v2677_v18 = vpop.f32.mrb[15].mxu1 }
0x1f65   :  { %2941 = vtanh.f32 %v1744_v17  ;;  %v2392_v20 = vmul.f32 -1.442695, %v1744_v17 }
0x1f67   :  { %2943 = vpow2.f32 %v2392_v20 }
0x1f6f   :  { %v2942_v19 = vpop.eup %2941 }
0x1f70   :  { %1759 = vrot.lane.b32.xlu0 %v2942_v19, %s2984_s25 }
0x1f71   :  { %v2944_v21 = vpop.eup %2943 }
0x1f72   :  { %v1748_v22 = vadd.f32 1.0, %v2944_v21 }
0x1f74   :  { %2945 = vrcp.f32 %v1748_v22  ;;  %v1290_v22 = vadd.f32 %v3325_v52, %v3331_v55 }
0x1f7e   :  { %v2946_v23 = vpop.eup %2945 }
0x1f7f   :  { %v1757_v27 = vmul.f32 %v2946_v23, %v1755_v26 }
0x1fe2   :  { %v1760_v24 = vpop.permute.xlu0 %1759 }
0x1fe3   :  { %v1762_v25 = vmul.f32 %v2946_v23, %v1760_v24 }
0x1fe5   :  { %1764 = vrot.lane.b32.xlu0 %v1762_v25, %s2985_s26 }
0x2057   :  { %v1765_v62 = vpop.permute.xlu0 %1764 }
0x2058   :  { %v1767_v28 = vadd.f32 %v1765_v62, %v1757_v27 }
0x205a   :  { %2947 = vtanh.f32 %v1767_v28 }
0x2064   :  { %v2948_v29 = vpop.eup %2947 }
0x2065   :  { %1770 = vrot.lane.b32.xlu1 %v2948_v29, %s2984_s25 }
0x2069   :  { %1775 = vrot.lane.b32.xlu1 %v1767_v28, %s2986_s3 }
0x20d7   :  { %v1771_v8 = vpop.permute.xlu1 %1770 }
0x20d8   :  { %v1773_v30 = vmul.f32 %v2946_v23, %v1771_v8 }
0x20da   :  { %1780 = vrot.lane.b32.xlu0 %v1773_v30, %s2985_s26 }
0x20db   :  { %v1776_v31 = vpop.permute.xlu1 %1775 }
0x20dc   :  { %1778 = vst.msk [vmem:[#allocation5] sm:$0xff] %vm187_vm2, %v1776_v31 }
0x20e3   :  { %v1871_v32 = vld [vmem:[#allocation5] sm:$0xff] }
0x20e4   :  { %1873 = vrot.lane.b32.xlu1 %v1871_v32, %s2985_s26 }
0x214c   :  { %v1781_v33 = vpop.permute.xlu0 %1780 }
0x214d   :  { %1783 = vst.msk [vmem:[#allocation4] sm:$0xff] %vm187_vm2, %v1781_v33 }
0x2154   :  { %v1785_v12 = vld [vmem:[#allocation4] sm:$0xff] }
0x2155   :  { %2687 = vmatmul.mubr.msk.f32.vlgmr.msra.gmra.mrb[24].mxu0 %vm187_vm2, %v1785_v12 }
0x2156   :  { %2831 = vmatpush3.bf16.msra.mxu0 %v3285_v41  ;;  %2708 = vmatprep.mubr.msk.f32.mxu0 %vm2982_vm1, %v2983_v4  ;;  %v1874_v42 = vpop.permute.xlu1 %1873 }
0x2157   :  { %2832 = vmatprep.subr.bf16.mxu0 %v2981_v0 }
0x215a   :  { %2834 = vmatpush3.bf16.msra.mxu0 %v3294_v44 }
0x215b   :  { %2841 = vmatprep.subr.bf16.mxu0 %v2981_v0 }
0x2228   :  { %v1859_v35 = vpop.f32.mrb[24].mxu0 }
0x2229   :  { %v1863_v60 = vadd.f32 %v1859_v35, %v1280_v34  ;;  %v2688_v6 = vpop.f32.mrb[25].mxu0 }
0x222b   :  { %2949 = vtanh.f32 %v1863_v60  ;;  %v2394_v37 = vmul.f32 -1.442695, %v1863_v60 }
0x222d   :  { %2951 = vpow2.f32 %v2394_v37  ;;  %v1295_v37 = vadd.f32 %v3329_v54, %v3325_v52 }
0x2235   :  { %v2950_v36 = vpop.eup %2949 }
0x2236   :  { %1878 = vrot.lane.b32.xlu0 %v2950_v36, %s2984_s25 }
0x2237   :  { %v2952_v14 = vpop.eup %2951 }
0x2238   :  { %v1867_v11 = vadd.f32 1.0, %v2952_v14 }
0x223a   :  { %2953 = vrcp.f32 %v1867_v11 }
0x2244   :  { %v2954_v38 = vpop.eup %2953 }
0x2245   :  { %v1876_v43 = vmul.f32 %v2954_v38, %v1874_v42 }
0x22a8   :  { %v1879_v39 = vpop.permute.xlu0 %1878 }
0x22a9   :  { %v1881_v40 = vmul.f32 %v2954_v38, %v1879_v39 }
0x22ab   :  { %1883 = vrot.lane.b32.xlu0 %v1881_v40, %s2985_s26 }
0x231d   :  { %v1884_v3 = vpop.permute.xlu0 %1883 }
0x231e   :  { %v1886_v45 = vadd.f32 %v1884_v3, %v1876_v43 }
0x2320   :  { %2955 = vtanh.f32 %v1886_v45 }
0x232a   :  { %v2956_v46 = vpop.eup %2955 }
0x232b   :  { %1889 = vrot.lane.b32.xlu1 %v2956_v46, %s2984_s25 }
0x232f   :  { %1894 = vrot.lane.b32.xlu1 %v1886_v45, %s2986_s3 }
0x239d   :  { %v1890_v47 = vpop.permute.xlu1 %1889 }
0x239e   :  { %v1892_v48 = vmul.f32 %v2954_v38, %v1890_v47 }
0x23a0   :  { %1899 = vrot.lane.b32.xlu0 %v1892_v48, %s2985_s26 }
0x23a1   :  { %v1895_v49 = vpop.permute.xlu1 %1894 }
0x23a2   :  { %1897 = vst.msk [vmem:[#allocation5] sm:$0xff] %vm187_vm2, %v1895_v49 }
0x23a9   :  { %v1990_v50 = vld [vmem:[#allocation5] sm:$0xff] }
0x23aa   :  { %1992 = vrot.lane.b32.xlu1 %v1990_v50, %s2985_s26  ;;  %v2261_v50 = vld [vmem:[%s3475_s7] sm:$0xff] }
0x2412   :  { %v1900_v51 = vpop.permute.xlu0 %1899 }
0x2413   :  { %1902 = vst.msk [vmem:[#allocation4] sm:$0xff] %vm187_vm2, %v1900_v51  ;;  %v2262_v51 = vld [vmem:[%s3475_s7 + $0x8] sm:$0xff] }
0x241a   :  { %v1904_v53 = vld [vmem:[#allocation4] sm:$0xff] }
0x241b   :  { %2698 = vmatmul.mubr.msk.f32.vlgmr.msra.gmra.mrb[16].mxu1 %vm187_vm2, %v1904_v53  ;;  %v2842_v53 = vpack.c.bf16 %v2262_v51, %v2261_v50 }
0x241c   :  { %2837 = vmatpush3.bf16.msra.mxu1 %v3285_v41  ;;  %2719 = vmatprep.mubr.msk.f32.mxu1 %vm2982_vm1, %v2983_v4 }
0x241d   :  { %2838 = vmatprep.subr.bf16.mxu1 %v2981_v0 }
0x2420   :  { %2840 = vmatpush3.bf16.msra.mxu1 %v3294_v44  ;;  %v1993_v44 = vpop.permute.xlu1 %1992 }
0x24ee   :  { %v1978_v57 = vpop.f32.mrb[16].mxu1 }
0x24ef   :  { %v1982_v58 = vadd.f32 %v1978_v57, %v1285_v56  ;;  %v2699_v1 = vpop.f32.mrb[17].mxu1  ;;  %v2263_v56 = vld [vmem:[%s3475_s7 + $0x10] sm:$0xff]  ;;  %v2264_v57 = vld [vmem:[%s3475_s7 + $0x18] sm:$0xff] }
0x24f1   :  { %2957 = vtanh.f32 %v1982_v58  ;;  %v2396_v63 = vmul.f32 -1.442695, %v1982_v58  ;;  %v2845_v58 = vpack.c.bf16 %v2264_v57, %v2263_v56 }
0x24f3   :  { %2959 = vpow2.f32 %v2396_v63 }
0x24fb   :  { %v2958_v59 = vpop.eup %2957 }
0x24fc   :  { %1997 = vrot.lane.b32.xlu0 %v2958_v59, %s2984_s25 }
0x24fd   :  { %v2960_v41 = vpop.eup %2959 }
0x24fe   :  { %v1986_v13 = vadd.f32 1.0, %v2960_v41 }
0x2500   :  { %2961 = vrcp.f32 %v1986_v13 }
0x250a   :  { %v2962_v5 = vpop.eup %2961 }
0x250b   :  { %v1995_v15 = vmul.f32 %v2962_v5, %v1993_v44 }
0x256e   :  { %v1998_v9 = vpop.permute.xlu0 %1997 }
0x256f   :  { %v2000_v10 = vmul.f32 %v2962_v5, %v1998_v9 }
0x2571   :  { %2002 = vrot.lane.b32.xlu0 %v2000_v10, %s2985_s26 }
0x25e3   :  { %v2003_v2 = vpop.permute.xlu0 %2002 }
0x25e4   :  { %v2005_v61 = vadd.f32 %v2003_v2, %v1995_v15 }
0x25e6   :  { %2963 = vtanh.f32 %v2005_v61 }
0x25f0   :  { %v2964_v16 = vpop.eup %2963 }
0x25f1   :  { %2008 = vrot.lane.b32.xlu1 %v2964_v16, %s2984_s25 }
0x25f5   :  { %2013 = vrot.lane.b32.xlu1 %v2005_v61, %s2986_s3 }
0x2663   :  { %v2009_v7 = vpop.permute.xlu1 %2008 }
0x2664   :  { %v2011_v17 = vmul.f32 %v2962_v5, %v2009_v7  ;;  %v2401_v5 = vld [vmem:[%s3476_s8] ss:$0 sm:$0xff] }
0x2666   :  { %2018 = vrot.lane.b32.xlu0 %v2011_v17, %s2985_s26 }
0x2667   :  { %v2014_v18 = vpop.permute.xlu1 %2013 }
0x2668   :  { %2016 = vst.msk [vmem:[#allocation5] sm:$0xff] %vm187_vm2, %v2014_v18 }
0x266f   :  { %v2109_v19 = vld [vmem:[#allocation5] sm:$0xff] }
0x2670   :  { %2111 = vrot.lane.b32.xlu1 %v2109_v19, %s2985_s26 }
0x26d8   :  { %v2019_v20 = vpop.permute.xlu0 %2018 }
0x26d9   :  { %2021 = vst.msk [vmem:[#allocation4] sm:$0xff] %vm187_vm2, %v2019_v20 }
0x26e0   :  { %v2023_v21 = vld [vmem:[#allocation4] sm:$0xff] }
0x26e1   :  { %2709 = vmatmul.mubr.msk.f32.vlgmr.msra.gmra.mrb[26].mxu0 %vm187_vm2, %v2023_v21 }
0x26e2   :  { %2730 = vmatprep.mubr.msk.f32.mxu0 %vm2982_vm1, %v2983_v4  ;;  %v2112_v4 = vpop.permute.xlu1 %2111  ;;  %2843 = vmatpush3.bf16.msra.mxu0 %v2842_v53 }
0x26e3   :  { %2844 = vmatprep.subr.bf16.mxu0 %v2981_v0 }
0x26e6   :  { %2846 = vmatpush3.bf16.msra.mxu0 %v2845_v58 }
0x27b4   :  { %v2097_v23 = vpop.f32.mrb[26].mxu0 }
0x27b5   :  { %v2101_v24 = vadd.f32 %v2097_v23, %v1290_v22  ;;  %v2710_v25 = vpop.f32.mrb[27].mxu0 }
0x27b7   :  { %2965 = vtanh.f32 %v2101_v24  ;;  %v2398_v27 = vmul.f32 -1.442695, %v2101_v24 }
0x27b9   :  { %2967 = vpow2.f32 %v2398_v27 }
0x27c1   :  { %v2966_v26 = vpop.eup %2965 }
0x27c2   :  { %2116 = vrot.lane.b32.xlu0 %v2966_v26, %s2984_s25 }
0x27c3   :  { %v2968_v62 = vpop.eup %2967 }
0x27c4   :  { %v2105_v28 = vadd.f32 1.0, %v2968_v62 }
0x27c6   :  { %2969 = vrcp.f32 %v2105_v28 }
0x27d0   :  { %v2970_v29 = vpop.eup %2969 }
0x27d1   :  { %v2114_v31 = vmul.f32 %v2970_v29, %v2112_v4 }
0x2834   :  { %v2117_v8 = vpop.permute.xlu0 %2116 }
0x2835   :  { %v2119_v30 = vmul.f32 %v2970_v29, %v2117_v8 }
0x2837   :  { %2121 = vrot.lane.b32.xlu0 %v2119_v30, %s2985_s26 }
0x28a9   :  { %v2122_v55 = vpop.permute.xlu0 %2121 }
0x28aa   :  { %v2124_v32 = vadd.f32 %v2122_v55, %v2114_v31 }
0x28ac   :  { %2971 = vtanh.f32 %v2124_v32 }
0x28b6   :  { %v2972_v33 = vpop.eup %2971 }
0x28b7   :  { %2127 = vrot.lane.b32.xlu1 %v2972_v33, %s2984_s25 }
0x28bb   :  { %2132 = vrot.lane.b32.xlu1 %v2124_v32, %s2986_s3 }
0x2929   :  { %v2128_v12 = vpop.permute.xlu1 %2127 }
0x292a   :  { %v2130_v34 = vmul.f32 %v2970_v29, %v2128_v12 }
0x292c   :  { %2137 = vrot.lane.b32.xlu0 %v2130_v34, %s2985_s26 }
0x292d   :  { %v2133_v35 = vpop.permute.xlu1 %2132 }
0x292e   :  { %2135 = vst.msk [vmem:[#allocation5] sm:$0xff] %vm187_vm2, %v2133_v35 }
0x2935   :  { %v2228_v60 = vld [vmem:[#allocation5] sm:$0xff] }
0x2936   :  { %2230 = vrot.lane.b32.xlu1 %v2228_v60, %s2985_s26 }
0x299e   :  { %v2138_v6 = vpop.permute.xlu0 %2137 }
0x299f   :  { %2140 = vst.msk [vmem:[#allocation4] sm:$0xff] %vm187_vm2, %v2138_v6 }
0x29a6   :  { %v2142_v36 = vld [vmem:[#allocation4] sm:$0xff] }
0x29a7   :  { %2720 = vmatmul.mubr.msk.f32.vlgmr.msra.gmra.mrb[18].mxu1 %vm187_vm2, %v2142_v36 }
0x29a8   :  { %v2231_v47 = vpop.permute.xlu1 %2230 }
0x2a7a   :  { %v2216_v14 = vpop.f32.mrb[18].mxu1 }
0x2a7b   :  { %v2220_v11 = vadd.f32 %v2216_v14, %v1295_v37  ;;  %v2721_v38 = vpop.f32.mrb[19].mxu1 }
0x2a7d   :  { %2973 = vtanh.f32 %v2220_v11  ;;  %v2400_v40 = vmul.f32 -1.442695, %v2220_v11 }
0x2a7f   :  { %2975 = vpow2.f32 %v2400_v40 }
0x2a87   :  { %v2974_v39 = vpop.eup %2973 }
0x2a88   :  { %2235 = vrot.lane.b32.xlu0 %v2974_v39, %s2984_s25 }
0x2a89   :  { %v2976_v42 = vpop.eup %2975 }
0x2a8a   :  { %v2224_v43 = vadd.f32 1.0, %v2976_v42 }
0x2a8c   :  { %2977 = vrcp.f32 %v2224_v43 }
0x2a96   :  { %v2978_v3 = vpop.eup %2977 }
0x2a97   :  { %v2233_v48 = vmul.f32 %v2978_v3, %v2231_v47 }
0x2afa   :  { %v2236_v45 = vpop.permute.xlu0 %2235 }
0x2afb   :  { %v2238_v46 = vmul.f32 %v2978_v3, %v2236_v45 }
0x2afd   :  { %2240 = vrot.lane.b32.xlu0 %v2238_v46, %s2985_s26 }
0x2b6f   :  { %v2241_v52 = vpop.permute.xlu0 %2240 }
0x2b70   :  { %v2243_v54 = vadd.f32 %v2241_v52, %v2233_v48 }
0x2b72   :  { %2979 = vtanh.f32 %v2243_v54 }
0x2b7c   :  { %v2980_v49 = vpop.eup %2979 }
0x2b7d   :  { %2246 = vrot.lane.b32.xlu1 %v2980_v49, %s2984_s25 }
0x2b81   :  { %2251 = vrot.lane.b32.xlu1 %v2243_v54, %s2986_s3 }
0x2bef   :  { %v2247_v1 = vpop.permute.xlu1 %2246 }
0x2bf0   :  { %v2249_v59 = vmul.f32 %v2978_v3, %v2247_v1 }
0x2bf2   :  { %2256 = vrot.lane.b32.xlu0 %v2249_v59, %s2985_s26 }
0x2bf3   :  { %v2252_v63 = vpop.permute.xlu1 %2251 }
0x2bf4   :  { %2254 = vst.msk [vmem:[#allocation5] sm:$0xff] %vm187_vm2, %v2252_v63 }
0x2c64   :  { %v2257_v41 = vpop.permute.xlu0 %2256 }
0x2c65   :  { %2259 = vst.msk [vmem:[#allocation4] sm:$0xff] %vm187_vm2, %v2257_v41 }
0x2c6c   :  { %v2260_v13 = vld [vmem:[#allocation4] sm:$0xff] }
0x2c6d   :  { %2731 = vmatmul.mubr.msk.f32.vlgmr.msra.gmra.mrb[28].mxu0 %vm187_vm2, %v2260_v13 }
0x2d40   :  { %v2341_v9 = vpop.f32.mrb[28].mxu0 }
0x2d41   :  { %v2342_v0 = vadd.f32 %v2401_v5, %v2341_v9  ;;  %v2732_v10 = vpop.f32.mrb[29].mxu0 }
0x2d43   :  { %2346 = vst.msk [vmem:[%s3477_s9] sm:$0xff] %vm2345_vm3, %v2342_v0 }

</bundles_post_ra>
